<compile_context>
chip_gen: v7x
topology: tpu7x:2x2x1
jax: 0.10.0
libtpu: 0.0.40
codegen_flags: <defaults>
</compile_context>

<pallas_src>
import functools

import numpy as np
import jax
import jax.numpy as jnp
from jax.experimental import pallas as pl
from jax.experimental.pallas import tpu as pltpu


VMEM_SPEC = pl.BlockSpec(memory_space=pltpu.MemorySpace.VMEM)


# ----------------------------------------------------------------------------
# Fused Pallas kernel: branches -> heads -> per-head softmax (x2) -> NLL losses
# ----------------------------------------------------------------------------

def _make_fused_kernel(num_grades):
    ng = num_grades

    def kernel(x1_ref, x2_ref, xa_ref,
               w1_ref, b1_ref, w2_ref, b2_ref, wa_ref, ba_ref,
               wh1_ref, wh2_ref, wha_ref, bh_ref,
               grp_ref, cls_ref, wcls_ref, t_ref,
               probs2_ref, loss_ref):
        f32 = jnp.float32
        bf16 = jnp.bfloat16

        # --- branch projections: bf16 MXU operands, f32 accumulation ----------
        f1 = jnp.dot(x1_ref[...], w1_ref[...], preferred_element_type=f32) + b1_ref[...]
        f2 = jnp.dot(x2_ref[...], w2_ref[...], preferred_element_type=f32) + b2_ref[...]
        fa = jnp.dot(xa_ref[...], wa_ref[...], preferred_element_type=f32) + ba_ref[...]

        # --- 5 stacked heads; block-split weights == concat(features)@W_heads --
        logits = (jnp.dot(f1.astype(bf16), wh1_ref[...], preferred_element_type=f32)
                  + jnp.dot(f2.astype(bf16), wh2_ref[...], preferred_element_type=f32)
                  + jnp.dot(fa.astype(bf16), wha_ref[...], preferred_element_type=f32)
                  + bh_ref[...])

        grp = grp_ref[...]
        # --- per-head softmax #1 (row-wide max is shift-invariant per group) ---
        e = jnp.exp(logits - jnp.max(logits, axis=-1, keepdims=True))
        probs = e * pl.reciprocal(
            jnp.dot(e, grp, preferred_element_type=f32), approx=True)
        # --- per-head softmax #2 (reference 'infer' path softmaxes probs again) -
        e2 = jnp.exp(probs - jnp.max(probs, axis=-1, keepdims=True))
        probs2_ref[...] = e2 * pl.reciprocal(
            jnp.dot(e2, grp, preferred_element_type=f32), approx=True)

        # --- fused weighted-NLL grade losses (3 groups + combined mean) --------
        eps = 1e-5
        logp = jnp.log(jnp.clip(probs, eps, 1.0 - eps))
        t = t_ref[...]                                     # (Npad, 5*ng) targets
        onehot = jnp.where(jnp.logical_and(cls_ref[...] == t, t >= 0), 1.0, 0.0)
        wpick = onehot * wcls_ref[...]                     # nll class weights [1,2,4]
        wlogp = wpick * logp
        col = jax.lax.broadcasted_iota(jnp.int32, t.shape, 1)

        def group_loss(mask_bool):
            m = mask_bool.astype(f32)
            num = jnp.sum(wlogp * m)
            den = jnp.sum(wpick * m)
            # max() replaces the reference's host-sync assert: an all-ignored
            # group yields 0 instead of NaN.
            return -num / jnp.maximum(den, 1e-12)

        l_t2 = group_loss(col < ng)                                   # scs
        l_ax = group_loss(jnp.logical_and(col >= ng, col < 3 * ng))   # rss + lss
        l_t1 = group_loss(col >= 3 * ng)                              # rfn + lfn
        comb = (l_t1 + l_t2 + l_ax) / 3.0

        lane = jax.lax.broadcasted_iota(jnp.int32, (1, 4), 1)
        loss_ref[...] = (l_t1 * (lane == 0).astype(f32)
                         + l_t2 * (lane == 1).astype(f32)
                         + l_ax * (lane == 2).astype(f32)
                         + comb * (lane == 3).astype(f32))

    return kernel


def _fused_head_loss_pallas(params, x1, x2, xa, t15, *, num_grades):
    """Single fused pallas_call (everything VMEM-resident, no grid).

    For large batches add a row-block grid with dimension_semantics=("parallel",)
    so v7x's second TensorCore is used; at N<=16 one un-gridded call is optimal.
    """
    npad = x1.shape[0]
    nout = 5 * num_grades
    operands = (x1, x2, xa,
                params["w_sag_t1"], params["b_sag_t1"],
                params["w_sag_t2"], params["b_sag_t2"],
                params["w_ax"], params["b_ax"],
                params["wh_t1"], params["wh_t2"], params["wh_ax"],
                params["b_heads"],
                params["grp"], params["cls_idx"], params["wclass"], t15)

    k_sag = params["w_sag_t1"].shape[0]
    k_ax = params["w_ax"].shape[0]
    fdim = params["w_sag_t1"].shape[1]
    flops = 2 * npad * (2 * k_sag * fdim + k_ax * fdim + 3 * fdim * nout
                        + 2 * nout * nout)
    bytes_accessed = sum(int(np.prod(o.shape)) * o.dtype.itemsize for o in operands)
    bytes_accessed += npad * nout * 4 + 16

    return pl.pallas_call(
        _make_fused_kernel(num_grades),
        out_shape=(jax.ShapeDtypeStruct((npad, nout), jnp.float32),
                   jax.ShapeDtypeStruct((1, 4), jnp.float32)),
        in_specs=[VMEM_SPEC] * len(operands),
        out_specs=(VMEM_SPEC, VMEM_SPEC),
        cost_estimate=pl.CostEstimate(flops=int(flops),
                                      transcendentals=int(5 * npad * nout),
                                      bytes_accessed=int(bytes_accessed)),
    )(*operands)


# ----------------------------------------------------------------------------
# Plain-JAX glue (jitted): batched crop gather + resize + row building
# ----------------------------------------------------------------------------

def _lin_axis_resize(x, axis, out_size):
    """PyTorch align_corners=False linear resize along one axis. Identity when
    sizes already match (which is the case for every configuration used here,
    since the padded crop extent equals the interpolation target)."""
    in_size = x.shape[axis]
    if in_size == out_size:
        return x
    o = np.arange(out_size, dtype=np.float64)
    src = np.clip((o + 0.5) * (in_size / out_size) - 0.5, 0.0, in_size - 1)
    i0 = np.floor(src).astype(np.int32)
    i1 = np.minimum(i0 + 1, in_size - 1)
    w1 = (src - i0).astype(np.float32)
    w0 = (1.0 - w1).astype(np.float32)
    a = jnp.take(x, jnp.asarray(i0), axis=axis)
    b = jnp.take(x, jnp.asarray(i1), axis=axis)
    shp = [1] * x.ndim
    shp[axis] = out_size
    return a * jnp.asarray(w0).reshape(shp) + b * jnp.asarray(w1).reshape(shp)


def _full_depth_pool_weights(D, zc):
    """Fold the reference extract_crop_3d full-depth semantics (z-pad by
    half_depth around zc, align_corners=False depth resize back to D) together
    with the stub's mean-over-depth into a single weight per original slice."""
    half_depth = D // 2
    pad_l = max(0, half_depth - zc)
    pad_r = max(0, zc + half_depth - D)
    P = D + pad_l + pad_r
    if P == D:
        return np.full((D,), 1.0 / D, np.float32)
    o = np.arange(D, dtype=np.float64)
    src = np.clip((o + 0.5) * (P / D) - 0.5, 0.0, P - 1)
    i0 = np.floor(src).astype(np.int64)
    i1 = np.minimum(i0 + 1, P - 1)
    w1 = src - i0
    col = np.zeros((P,), np.float64)
    np.add.at(col, i0, 1.0 - w1)
    np.add.at(col, i1, w1)
    return (col[pad_l:pad_l + D] / D).astype(np.float32)


def _device_forward(params, img_t1, img_t2, img_ax, wd_t1, wd_t2,
                    y_t1, x_t1, y_t2, x_t2, d_ax, y_ax, x_ax, samp_idx,
                    truth_t1, truth_t2, truth_ax,
                    *, crop_size, in_chans, num_grades, output_type):
    n = samp_idx.shape[0]
    half = crop_size // 2
    ng = num_grades

    def sag_rows(img, wd, yi, xi):
        d_tot, hh, ww = img.shape
        # crop z-pad + depth resize + mean, folded into one weighted depth pool
        pooled = jnp.dot(wd, img.reshape(d_tot, hh * ww).astype(jnp.float32))
        pooled = pooled.reshape(-1, hh, ww)
        padded = jnp.pad(pooled, ((0, 0), (half, half), (half, half)))
        crops = padded[samp_idx[:, None, None], yi[:, :, None], xi[:, None, :]]
        crops = _lin_axis_resize(crops, -2, crop_size)
        crops = _lin_axis_resize(crops, -1, crop_size)
        flat = crops.reshape(n, crop_size * crop_size)
        return jnp.tile(flat, (1, in_chans))

    rows_t1 = sag_rows(img_t1, wd_t1, y_t1, x_t1)
    rows_t2 = sag_rows(img_t2, wd_t2, y_t2, x_t2)

    # axial: one pad (extra zero depth slice == out-of-range sentinel) + gather
    padded_ax = jnp.pad(img_ax.astype(jnp.float32),
                        ((0, 1), (half, half), (half, half)))
    crops_ax = padded_ax[d_ax[:, :, None, None], y_ax[:, None, :, None],
                         x_ax[:, None, None, :]]
    crops_ax = _lin_axis_resize(crops_ax, -2, crop_size)
    crops_ax = _lin_axis_resize(crops_ax, -1, crop_size)
    rows_ax = crops_ax.reshape(n, 8 * crop_size * crop_size)

    # pad rows to a bf16 sublane multiple; cast MXU operands to bf16
    n_pad = (-n) % 16

    def prep(m):
        return jnp.pad(m, ((0, n_pad), (0, 0))).astype(jnp.bfloat16)

    # per-(row, head) targets expanded to the (Npad, 5*ng) lane layout
    # head order: [scs, rss, lss, rfn, lfn]
    t_head = jnp.stack([truth_t2[:, :5],
                        truth_ax[:, 5:10],
                        truth_ax[:, :5],
                        truth_t1[:, 5:10],
                        truth_t1[:, :5]], axis=-1)
    t15 = jnp.repeat(t_head.reshape(n, 5).astype(jnp.int32), ng, axis=-1)
    t15 = jnp.pad(t15, ((0, n_pad), (0, 0)), constant_values=-1)

    probs2, losses = _fused_head_loss_pallas(
        params, prep(rows_t1), prep(rows_t2), prep(rows_ax), t15, num_grades=ng)

    probs2 = probs2[:n].reshape(-1, 5, 5, ng)          # (B, level, head, grade)
    scs = probs2[:, :, 0, :]
    rss = probs2[:, :, 1, :]
    lss = probs2[:, :, 2, :]
    rfn = probs2[:, :, 3, :]
    lfn = probs2[:, :, 4, :]

    out = {}
    if "loss" in output_type:
        out["grade_loss_sagittal_t1"] = losses[0, 0]
        out["grade_loss_sagittal_t2_stir"] = losses[0, 1]
        out["grade_loss_axial"] = losses[0, 2]
        out["grade_loss"] = losses[0, 3]
    if "infer" in output_type:
        out["grade_sagittal_t1"] = jnp.concatenate([lfn, rfn], axis=1)
        out["grade_sagittal_t2_stir"] = scs
        out["grade_axial_t2"] = jnp.concatenate([lss, rss], axis=1)
    return out


# ----------------------------------------------------------------------------
# Model
# ----------------------------------------------------------------------------

class SecondStageModelV3Pallas:
    def __init__(self, key, crop_size=16, depth_size=6, num_grades=3, xy_max=80,
                 in_chans=3, branch_dim=256, output_type=("loss", "infer")):
        self.crop_size = crop_size
        self.depth_size = depth_size
        self.num_grades = num_grades
        self.xy_max = xy_max
        self.in_chans = in_chans
        self.branch_dim = branch_dim
        self.output_type = tuple(output_type)

        sag_in = in_chans * crop_size * crop_size   # depth-pooled, flattened stub input
        ax_in = 8 * crop_size * crop_size           # axial crop: 8 depth "channels"
        keys = jax.random.split(key, 8)

        def init_linear(k, fan_in, fan_out):
            kw, kb = jax.random.split(k)
            lim = 1.0 / np.sqrt(fan_in)
            w = jax.random.uniform(kw, (fan_in, fan_out), jnp.float32, -lim, lim)
            b = jax.random.uniform(kb, (1, fan_out), jnp.float32, -lim, lim)
            return w, b

        # TODO(synk): ResNeXt2D / ResNeXt3D backbone definitions are not in the
        # provided source; each branch is a deterministic stub = depth-pool +
        # flatten + linear projection to `branch_dim` features.
        w1, b1 = init_linear(keys[0], sag_in, branch_dim)
        w2, b2 = init_linear(keys[1], sag_in, branch_dim)
        wa, ba = init_linear(keys[2], ax_in, branch_dim)

        comb = 3 * branch_dim
        head_ws, head_bs = [], []
        for kk in keys[3:8]:                         # [scs, rss, lss, rfn, lfn]
            w, b = init_linear(kk, comb, num_grades)
            head_ws.append(w)
            head_bs.append(b)
        w_heads = jnp.concatenate(head_ws, axis=1)   # (comb, 5*ng)
        b_heads = jnp.concatenate(head_bs, axis=1)   # (1, 5*ng)

        nout = 5 * num_grades
        grp = np.zeros((nout, nout), np.float32)
        for h in range(5):
            grp[h * num_grades:(h + 1) * num_grades,
                h * num_grades:(h + 1) * num_grades] = 1.0
        base_w = np.asarray([1.0, 2.0, 4.0], np.float32)[:num_grades]

        bf16 = jnp.bfloat16
        self.params = {
            "w_sag_t1": w1.astype(bf16), "b_sag_t1": b1,
            "w_sag_t2": w2.astype(bf16), "b_sag_t2": b2,
            "w_ax": wa.astype(bf16), "b_ax": ba,
            "wh_t1": w_heads[:branch_dim].astype(bf16),
            "wh_t2": w_heads[branch_dim:2 * branch_dim].astype(bf16),
            "wh_ax": w_heads[2 * branch_dim:].astype(bf16),
            "b_heads": b_heads,
            "grp": jnp.asarray(grp),
            "cls_idx": jnp.asarray(np.tile(np.arange(num_grades), 5)[None, :],
                                   jnp.int32),
            "wclass": jnp.asarray(np.tile(base_w, 5)[None, :], jnp.float32),
        }

        self._device_fn = jax.jit(functools.partial(
            _device_forward, crop_size=crop_size, in_chans=in_chans,
            num_grades=num_grades, output_type=self.output_type))

    # TODO(synk): the first-stage zxy_predictor is not defined in the provided
    # source; deterministic frozen stub with the same interface, evaluated on
    # the host (numpy) so the crop path issues no device->host syncs.
    def _zxy_stub(self, D):
        B = D.shape[0]
        p = np.arange(10, dtype=np.float64)
        z = (D.astype(np.float64)[:, None] - 1.0) * (0.25 + 0.05 * (p % 5))[None, :]
        x = self.xy_max * (0.30 + 0.05 * p)
        y = self.xy_max * (0.60 - 0.04 * p)
        xy = np.stack([np.broadcast_to(x, (B, 10)),
                       np.broadcast_to(y, (B, 10))], axis=-1)
        return z, xy

    def _round_clamp(self, v, size):
        return max(0, min(int(round(float(v))), size - 1))

    def _round_clamp_xy(self, x, y, H, W):
        xi = int(round(W * (float(x) / self.xy_max)))
        yi = int(round(H * (float(y) / self.xy_max)))
        return max(0, min(yi, H - 1)), max(0, min(xi, W - 1))

    def forward(self, batch):
        img_t1 = batch["image_sagittal_t1"]
        img_t2 = batch["image_sagittal_t2_stir"]
        img_ax = batch["image_axial_t2"]
        # one host pull per D array (the reference does .cpu().tolist() too)
        D_t1 = np.asarray(batch["D_sagittal_t1"]).astype(np.int64)
        D_t2 = np.asarray(batch["D_sagittal_t2_stir"]).astype(np.int64)
        D_ax = np.asarray(batch["D_axial_t2"]).astype(np.int64)
        B = int(D_t1.shape[0])
        H1, W1 = int(img_t1.shape[1]), int(img_t1.shape[2])
        H2, W2 = int(img_t2.shape[1]), int(img_t2.shape[2])
        Ha, Wa = int(img_ax.shape[1]), int(img_ax.shape[2])
        cum_t1 = np.concatenate([[0], np.cumsum(D_t1)]).astype(np.int64)
        cum_t2 = np.concatenate([[0], np.cumsum(D_t2)]).astype(np.int64)
        cum_ax = np.concatenate([[0], np.cumsum(D_ax)]).astype(np.int64)

        z_t1, xy_t1 = self._zxy_stub(D_t1)
        z_t2, xy_t2 = self._zxy_stub(D_t2)
        z_ax, xy_ax = self._zxy_stub(D_ax)

        half = self.crop_size // 2
        S = 2 * half
        half_depth_ax = 8 // 2
        N = B * 5
        ar_s = np.arange(S, dtype=np.int64)
        ar_d = np.arange(2 * half_depth_ax, dtype=np.int64)

        wd_t1 = np.zeros((B, int(cum_t1[-1])), np.float32)
        wd_t2 = np.zeros((B, int(cum_t2[-1])), np.float32)
        y_t1 = np.zeros((N, S), np.int32)
        x_t1 = np.zeros((N, S), np.int32)
        y_t2 = np.zeros((N, S), np.int32)
        x_t2 = np.zeros((N, S), np.int32)
        y_ax = np.zeros((N, S), np.int32)
        x_ax = np.zeros((N, S), np.int32)
        d_ax = np.zeros((N, 2 * half_depth_ax), np.int32)
        sentinel = int(cum_ax[-1])            # appended all-zero depth slice

        for i in range(B):
            zc1 = self._round_clamp(np.mean(z_t1[i]), int(D_t1[i]))
            zc2 = self._round_clamp(np.mean(z_t2[i]), int(D_t2[i]))
            wd_t1[i, cum_t1[i]:cum_t1[i + 1]] = _full_depth_pool_weights(int(D_t1[i]), zc1)
            wd_t2[i, cum_t2[i]:cum_t2[i + 1]] = _full_depth_pool_weights(int(D_t2[i]), zc2)
            for p in range(5):
                nrow = i * 5 + p
                # sagittal T1: midpoint of points p and p+5
                yy, xx = self._round_clamp_xy(
                    (xy_t1[i, p, 0] + xy_t1[i, p + 5, 0]) / 2,
                    (xy_t1[i, p, 1] + xy_t1[i, p + 5, 1]) / 2, H1, W1)
                y_t1[nrow] = yy + ar_s
                x_t1[nrow] = xx + ar_s
                # sagittal T2/STIR: single point p
                yy, xx = self._round_clamp_xy(xy_t2[i, p, 0], xy_t2[i, p, 1], H2, W2)
                y_t2[nrow] = yy + ar_s
                x_t2[nrow] = xx + ar_s
                # axial: midpoints of points p and p+5; zero sentinel for OOB slices
                yy, xx = self._round_clamp_xy(
                    (xy_ax[i, p, 0] + xy_ax[i, p + 5, 0]) / 2,
                    (xy_ax[i, p, 1] + xy_ax[i, p + 5, 1]) / 2, Ha, Wa)
                zz = self._round_clamp((z_ax[i, p] + z_ax[i, p + 5]) / 2, int(D_ax[i]))
                y_ax[nrow] = yy + ar_s
                x_ax[nrow] = xx + ar_s
                d_local = zz - half_depth_ax + ar_d
                d_ax[nrow] = np.where(
                    (d_local >= 0) & (d_local < int(D_ax[i])),
                    int(cum_ax[i]) + d_local, sentinel)
        samp_idx = np.repeat(np.arange(B, dtype=np.int32), 5)

        if "loss" in self.output_type:
            truth_t1 = jnp.asarray(batch["grade_sagittal_t1"], jnp.int32)
            truth_t2 = jnp.asarray(batch["grade_sagittal_t2_stir"], jnp.int32)
            truth_ax = jnp.asarray(batch["grade_axial_t2"], jnp.int32)
        else:
            dummy = jnp.full((B, 10), -1, jnp.int32)
            truth_t1 = truth_t2 = truth_ax = dummy

        return self._device_fn(
            self.params, img_t1, img_t2, img_ax,
            jnp.asarray(wd_t1), jnp.asarray(wd_t2),
            jnp.asarray(y_t1), jnp.asarray(x_t1),
            jnp.asarray(y_t2), jnp.asarray(x_t2),
            jnp.asarray(d_ax), jnp.asarray(y_ax), jnp.asarray(x_ax),
            jnp.asarray(samp_idx),
            truth_t1, truth_t2, truth_ax)


# ----------------------------------------------------------------------------
# Demo
# ----------------------------------------------------------------------------

if __name__ == "__main__":
    key = jax.random.PRNGKey(0)
    k_img1, k_img2, k_img3, k_model = jax.random.split(key, 4)

    B, H, W = 2, 32, 32
    D_t1 = jnp.array([6, 6], jnp.int32)
    D_t2 = jnp.array([6, 6], jnp.int32)
    D_ax = jnp.array([10, 10], jnp.int32)

    batch = {
        "image_sagittal_t1": jax.random.uniform(
            k_img1, (int(D_t1.sum()), H, W), jnp.float32),
        "D_sagittal_t1": D_t1,
        "image_sagittal_t2_stir": jax.random.uniform(
            k_img2, (int(D_t2.sum()), H, W), jnp.float32),
        "D_sagittal_t2_stir": D_t2,
        "image_axial_t2": jax.random.uniform(
            k_img3, (int(D_ax.sum()), H, W), jnp.float32),
        "D_axial_t2": D_ax,
        "grade_sagittal_t1": jnp.array(
            [[0, 1, 2, 0, 1, 2, 0, 1, -1, 2],
             [1, 2, 0, 1, 2, 0, -1, 1, 2, 0]], jnp.int32),
        "grade_sagittal_t2_stir": jnp.array(
            [[0, 1, 2, 1, 0, 2, 1, 0, 2, 1],
             [2, 0, 1, 2, 0, 1, 2, 0, 1, 2]], jnp.int32),
        "grade_axial_t2": jnp.array(
            [[1, 0, 2, 1, 0, -1, 2, 1, 0, 2],
             [0, 2, 1, 0, 2, 1, 0, -1, 1, 2]], jnp.int32),
    }

    model = SecondStageModelV3Pallas(
        k_model, crop_size=16, depth_size=6, num_grades=3, xy_max=80,
        in_chans=3, branch_dim=256, output_type=("loss", "infer"))

    out = model.forward(batch)
    jax.block_until_ready(out)
    print("KERNEL_OK")
</pallas_src>

<mosaic_0001>
module attributes {stable_mosaic.version = 11 : i64} {
  func.func private @main(%arg0: i32) attributes {dimension_semantics = [#tpu.dimension_semantics<core_parallel>], iteration_bounds = array<i64: 2>, tpu.core_type = #tpu.core_type<sc_scalar_subcore>, window_params = []} {
    return
  }
}

module attributes {stable_mosaic.version = 11 : i64} {
  func.func private @main(%arg0: i32) attributes {dimension_semantics = [#tpu.dimension_semantics<core_parallel>], iteration_bounds = array<i64: 2>, tpu.core_type = #tpu.core_type<sc_scalar_subcore>, window_params = []} {
    return
  }
}

module attributes {stable_mosaic.version = 11 : i64} {
  func.func @kernel(%arg0: memref<16x768xbf16, #tpu.memory_space<vmem>>, %arg1: memref<16x768xbf16, #tpu.memory_space<vmem>>, %arg2: memref<16x2048xbf16, #tpu.memory_space<vmem>>, %arg3: memref<768x256xbf16, #tpu.memory_space<vmem>>, %arg4: memref<1x256xf32, #tpu.memory_space<vmem>>, %arg5: memref<768x256xbf16, #tpu.memory_space<vmem>>, %arg6: memref<1x256xf32, #tpu.memory_space<vmem>>, %arg7: memref<2048x256xbf16, #tpu.memory_space<vmem>>, %arg8: memref<1x256xf32, #tpu.memory_space<vmem>>, %arg9: memref<256x15xbf16, #tpu.memory_space<vmem>>, %arg10: memref<256x15xbf16, #tpu.memory_space<vmem>>, %arg11: memref<256x15xbf16, #tpu.memory_space<vmem>>, %arg12: memref<1x15xf32, #tpu.memory_space<vmem>>, %arg13: memref<15x15xf32, #tpu.memory_space<vmem>>, %arg14: memref<1x15xi32, #tpu.memory_space<vmem>>, %arg15: memref<1x15xf32, #tpu.memory_space<vmem>>, %arg16: memref<16x15xi32, #tpu.memory_space<vmem>>, %arg17: memref<16x15xf32, #tpu.memory_space<vmem>>, %arg18: memref<1x4xf32, #tpu.memory_space<vmem>>) attributes {dimension_semantics = [], scalar_prefetch = 0 : i64, scratch_operands = 0 : i64, tpu.core_type = #tpu.core_type<tc>} {
    %c0 = arith.constant 0 : index
    %c0_0 = arith.constant 0 : index
    %0 = vector.load %arg0[%c0, %c0_0] : memref<16x768xbf16, #tpu.memory_space<vmem>>, vector<16x768xbf16>
    %c0_1 = arith.constant 0 : index
    %c0_2 = arith.constant 0 : index
    %1 = vector.load %arg3[%c0_1, %c0_2] : memref<768x256xbf16, #tpu.memory_space<vmem>>, vector<768x256xbf16>
    %cst = arith.constant dense<0.000000e+00> : vector<16x256xf32>
    %2 = tpu.matmul %0, %1, %cst {dimension_numbers = #tpu.dot_dimension_numbers<[1], [0], [0], [1], [0, 0, 1, 1], [], []>} : vector<16x768xbf16>, vector<768x256xbf16>, vector<16x256xf32> -> vector<16x256xf32>
    %c0_3 = arith.constant 0 : index
    %c0_4 = arith.constant 0 : index
    %3 = vector.load %arg4[%c0_3, %c0_4] : memref<1x256xf32, #tpu.memory_space<vmem>>, vector<1x256xf32>
    %4 = vector.broadcast %3 : vector<1x256xf32> to vector<16x256xf32>
    %5 = arith.addf %2, %4 : vector<16x256xf32>
    %c0_5 = arith.constant 0 : index
    %c0_6 = arith.constant 0 : index
    %6 = vector.load %arg1[%c0_5, %c0_6] : memref<16x768xbf16, #tpu.memory_space<vmem>>, vector<16x768xbf16>
    %c0_7 = arith.constant 0 : index
    %c0_8 = arith.constant 0 : index
    %7 = vector.load %arg5[%c0_7, %c0_8] : memref<768x256xbf16, #tpu.memory_space<vmem>>, vector<768x256xbf16>
    %cst_9 = arith.constant dense<0.000000e+00> : vector<16x256xf32>
    %8 = tpu.matmul %6, %7, %cst_9 {dimension_numbers = #tpu.dot_dimension_numbers<[1], [0], [0], [1], [0, 0, 1, 1], [], []>} : vector<16x768xbf16>, vector<768x256xbf16>, vector<16x256xf32> -> vector<16x256xf32>
    %c0_10 = arith.constant 0 : index
    %c0_11 = arith.constant 0 : index
    %9 = vector.load %arg6[%c0_10, %c0_11] : memref<1x256xf32, #tpu.memory_space<vmem>>, vector<1x256xf32>
    %10 = vector.broadcast %9 : vector<1x256xf32> to vector<16x256xf32>
    %11 = arith.addf %8, %10 : vector<16x256xf32>
    %c0_12 = arith.constant 0 : index
    %c0_13 = arith.constant 0 : index
    %12 = vector.load %arg2[%c0_12, %c0_13] : memref<16x2048xbf16, #tpu.memory_space<vmem>>, vector<16x2048xbf16>
    %c0_14 = arith.constant 0 : index
    %c0_15 = arith.constant 0 : index
    %13 = vector.load %arg7[%c0_14, %c0_15] : memref<2048x256xbf16, #tpu.memory_space<vmem>>, vector<2048x256xbf16>
    %cst_16 = arith.constant dense<0.000000e+00> : vector<16x256xf32>
    %14 = tpu.matmul %12, %13, %cst_16 {dimension_numbers = #tpu.dot_dimension_numbers<[1], [0], [0], [1], [0, 0, 1, 1], [], []>} : vector<16x2048xbf16>, vector<2048x256xbf16>, vector<16x256xf32> -> vector<16x256xf32>
    %c0_17 = arith.constant 0 : index
    %c0_18 = arith.constant 0 : index
    %15 = vector.load %arg8[%c0_17, %c0_18] : memref<1x256xf32, #tpu.memory_space<vmem>>, vector<1x256xf32>
    %16 = vector.broadcast %15 : vector<1x256xf32> to vector<16x256xf32>
    %17 = arith.addf %14, %16 : vector<16x256xf32>
    %18 = arith.truncf %5 : vector<16x256xf32> to vector<16x256xbf16>
    %c0_19 = arith.constant 0 : index
    %c0_20 = arith.constant 0 : index
    %19 = vector.load %arg9[%c0_19, %c0_20] : memref<256x15xbf16, #tpu.memory_space<vmem>>, vector<256x15xbf16>
    %cst_21 = arith.constant dense<0.000000e+00> : vector<16x15xf32>
    %20 = tpu.matmul %18, %19, %cst_21 {dimension_numbers = #tpu.dot_dimension_numbers<[1], [0], [0], [1], [0, 0, 1, 1], [], []>} : vector<16x256xbf16>, vector<256x15xbf16>, vector<16x15xf32> -> vector<16x15xf32>
    %21 = arith.truncf %11 : vector<16x256xf32> to vector<16x256xbf16>
    %c0_22 = arith.constant 0 : index
    %c0_23 = arith.constant 0 : index
    %22 = vector.load %arg10[%c0_22, %c0_23] : memref<256x15xbf16, #tpu.memory_space<vmem>>, vector<256x15xbf16>
    %cst_24 = arith.constant dense<0.000000e+00> : vector<16x15xf32>
    %23 = tpu.matmul %21, %22, %cst_24 {dimension_numbers = #tpu.dot_dimension_numbers<[1], [0], [0], [1], [0, 0, 1, 1], [], []>} : vector<16x256xbf16>, vector<256x15xbf16>, vector<16x15xf32> -> vector<16x15xf32>
    %24 = arith.addf %20, %23 : vector<16x15xf32>
    %25 = arith.truncf %17 : vector<16x256xf32> to vector<16x256xbf16>
    %c0_25 = arith.constant 0 : index
    %c0_26 = arith.constant 0 : index
    %26 = vector.load %arg11[%c0_25, %c0_26] : memref<256x15xbf16, #tpu.memory_space<vmem>>, vector<256x15xbf16>
    %cst_27 = arith.constant dense<0.000000e+00> : vector<16x15xf32>
    %27 = tpu.matmul %25, %26, %cst_27 {dimension_numbers = #tpu.dot_dimension_numbers<[1], [0], [0], [1], [0, 0, 1, 1], [], []>} : vector<16x256xbf16>, vector<256x15xbf16>, vector<16x15xf32> -> vector<16x15xf32>
    %28 = arith.addf %24, %27 : vector<16x15xf32>
    %c0_28 = arith.constant 0 : index
    %c0_29 = arith.constant 0 : index
    %29 = vector.load %arg12[%c0_28, %c0_29] : memref<1x15xf32, #tpu.memory_space<vmem>>, vector<1x15xf32>
    %30 = vector.broadcast %29 : vector<1x15xf32> to vector<16x15xf32>
    %31 = arith.addf %28, %30 : vector<16x15xf32>
    %c0_30 = arith.constant 0 : index
    %c0_31 = arith.constant 0 : index
    %32 = vector.load %arg13[%c0_30, %c0_31] : memref<15x15xf32, #tpu.memory_space<vmem>>, vector<15x15xf32>
    %cst_32 = arith.constant dense<0xFF800000> : vector<16xf32>
    %33 = vector.multi_reduction <maximumf>, %31, %cst_32 [1] : vector<16x15xf32> to vector<16xf32>
    %34 = vector.shape_cast %33 : vector<16xf32> to vector<16x1xf32>
    %35 = vector.broadcast %34 : vector<16x1xf32> to vector<16x15xf32>
    %36 = arith.subf %31, %35 : vector<16x15xf32>
    %37 = math.exp %36 : vector<16x15xf32>
    %cst_33 = arith.constant dense<0.000000e+00> : vector<16x15xf32>
    %38 = tpu.matmul %37, %32, %cst_33 {dimension_numbers = #tpu.dot_dimension_numbers<[1], [0], [0], [1], [0, 0, 1, 1], [], []>} : vector<16x15xf32>, vector<15x15xf32>, vector<16x15xf32> -> vector<16x15xf32>
    %39 = tpu.reciprocal %38 {approx = true} : vector<16x15xf32> -> vector<16x15xf32>
    %40 = arith.mulf %37, %39 : vector<16x15xf32>
    %cst_34 = arith.constant dense<0xFF800000> : vector<16xf32>
    %41 = vector.multi_reduction <maximumf>, %40, %cst_34 [1] : vector<16x15xf32> to vector<16xf32>
    %42 = vector.shape_cast %41 : vector<16xf32> to vector<16x1xf32>
    %43 = vector.broadcast %42 : vector<16x1xf32> to vector<16x15xf32>
    %44 = arith.subf %40, %43 : vector<16x15xf32>
    %45 = math.exp %44 : vector<16x15xf32>
    %cst_35 = arith.constant dense<0.000000e+00> : vector<16x15xf32>
    %46 = tpu.matmul %45, %32, %cst_35 {dimension_numbers = #tpu.dot_dimension_numbers<[1], [0], [0], [1], [0, 0, 1, 1], [], []>} : vector<16x15xf32>, vector<15x15xf32>, vector<16x15xf32> -> vector<16x15xf32>
    %47 = tpu.reciprocal %46 {approx = true} : vector<16x15xf32> -> vector<16x15xf32>
    %48 = arith.mulf %45, %47 : vector<16x15xf32>
    %c0_36 = arith.constant 0 : index
    %c0_37 = arith.constant 0 : index
    %49 = vector.load %arg17[%c0_36, %c0_37] : memref<16x15xf32, #tpu.memory_space<vmem>>, vector<16x15xf32>
    tpu.vector_store %arg17[%c0_36, %c0_37], %48 {strides = array<i32>} : memref<16x15xf32, #tpu.memory_space<vmem>>, vector<16x15xf32>,
    %cst_38 = arith.constant 9.99999974E-6 : f32
    %cst_39 = arith.constant 0.999989986 : f32
    %50 = vector.broadcast %cst_38 : f32 to vector<16x15xf32>
    %51 = arith.maximumf %50, %40 : vector<16x15xf32>
    %52 = vector.broadcast %cst_39 : f32 to vector<16x15xf32>
    %53 = arith.minimumf %52, %51 : vector<16x15xf32>
    %54 = math.log %53 : vector<16x15xf32>
    %c0_40 = arith.constant 0 : index
    %c0_41 = arith.constant 0 : index
    %55 = vector.load %arg16[%c0_40, %c0_41] : memref<16x15xi32, #tpu.memory_space<vmem>>, vector<16x15xi32>
    %c0_42 = arith.constant 0 : index
    %c0_43 = arith.constant 0 : index
    %56 = vector.load %arg14[%c0_42, %c0_43] : memref<1x15xi32, #tpu.memory_space<vmem>>, vector<1x15xi32>
    %57 = vector.broadcast %56 : vector<1x15xi32> to vector<16x15xi32>
    %58 = arith.cmpi eq, %57, %55 : vector<16x15xi32>
    %c0_i32 = arith.constant 0 : i32
    %59 = vector.broadcast %c0_i32 : i32 to vector<16x15xi32>
    %60 = arith.cmpi sge, %55, %59 : vector<16x15xi32>
    %61 = arith.andi %58, %60 : vector<16x15xi1>
    %cst_44 = arith.constant 1.000000e+00 : f32
    %cst_45 = arith.constant 0.000000e+00 : f32
    %62 = vector.broadcast %cst_44 : f32 to vector<16x15xf32>
    %63 = vector.broadcast %cst_45 : f32 to vector<16x15xf32>
    %64 = arith.select %61, %62, %63 : vector<16x15xi1>, vector<16x15xf32>
    %c0_46 = arith.constant 0 : index
    %c0_47 = arith.constant 0 : index
    %65 = vector.load %arg15[%c0_46, %c0_47] : memref<1x15xf32, #tpu.memory_space<vmem>>, vector<1x15xf32>
    %66 = vector.broadcast %65 : vector<1x15xf32> to vector<16x15xf32>
    %67 = arith.mulf %64, %66 : vector<16x15xf32>
    %68 = arith.mulf %67, %54 : vector<16x15xf32>
    %69 = tpu.iota {dimensions = array<i32: 1>} : vector<16x15xi32>
    %c3_i32 = arith.constant 3 : i32
    %70 = vector.broadcast %c3_i32 : i32 to vector<16x15xi32>
    %71 = arith.cmpi slt, %69, %70 : vector<16x15xi32>
    %72 = arith.extui %71 : vector<16x15xi1> to vector<16x15xi32>
    %73 = arith.sitofp %72 : vector<16x15xi32> to vector<16x15xf32>
    %74 = arith.mulf %68, %73 : vector<16x15xf32>
    %75 = vector.shape_cast %74 : vector<16x15xf32> to vector<1x16x15xf32>
    %cst_48 = arith.constant dense<0.000000e+00> : vector<1xf32>
    %76 = vector.multi_reduction <add>, %75, %cst_48 [1, 2] : vector<1x16x15xf32> to vector<1xf32>
    %77 = vector.shape_cast %76 : vector<1xf32> to vector<1x1x1xf32>
    %78 = vector.extract %77[0, 0, 0] : f32 from vector<1x1x1xf32>
    %79 = arith.mulf %67, %73 : vector<16x15xf32>
    %80 = vector.shape_cast %79 : vector<16x15xf32> to vector<1x16x15xf32>
    %cst_49 = arith.constant dense<0.000000e+00> : vector<1xf32>
    %81 = vector.multi_reduction <add>, %80, %cst_49 [1, 2] : vector<1x16x15xf32> to vector<1xf32>
    %82 = vector.shape_cast %81 : vector<1xf32> to vector<1x1x1xf32>
    %83 = vector.extract %82[0, 0, 0] : f32 from vector<1x1x1xf32>
    %cst_50 = arith.constant 0.000000e+00 : f32
    %84 = arith.subf %cst_50, %78 : f32
    %cst_51 = arith.constant 9.99999996E-13 : f32
    %85 = arith.maximumf %83, %cst_51 : f32
    %86 = arith.divf %84, %85 : f32
    %c3_i32_52 = arith.constant 3 : i32
    %87 = vector.broadcast %c3_i32_52 : i32 to vector<16x15xi32>
    %88 = arith.cmpi sge, %69, %87 : vector<16x15xi32>
    %c9_i32 = arith.constant 9 : i32
    %89 = vector.broadcast %c9_i32 : i32 to vector<16x15xi32>
    %90 = arith.cmpi slt, %69, %89 : vector<16x15xi32>
    %91 = arith.andi %88, %90 : vector<16x15xi1>
    %92 = arith.extui %91 : vector<16x15xi1> to vector<16x15xi32>
    %93 = arith.sitofp %92 : vector<16x15xi32> to vector<16x15xf32>
    %94 = arith.mulf %68, %93 : vector<16x15xf32>
    %95 = vector.shape_cast %94 : vector<16x15xf32> to vector<1x16x15xf32>
    %cst_53 = arith.constant dense<0.000000e+00> : vector<1xf32>
    %96 = vector.multi_reduction <add>, %95, %cst_53 [1, 2] : vector<1x16x15xf32> to vector<1xf32>
    %97 = vector.shape_cast %96 : vector<1xf32> to vector<1x1x1xf32>
    %98 = vector.extract %97[0, 0, 0] : f32 from vector<1x1x1xf32>
    %99 = arith.mulf %67, %93 : vector<16x15xf32>
    %100 = vector.shape_cast %99 : vector<16x15xf32> to vector<1x16x15xf32>
    %cst_54 = arith.constant dense<0.000000e+00> : vector<1xf32>
    %101 = vector.multi_reduction <add>, %100, %cst_54 [1, 2] : vector<1x16x15xf32> to vector<1xf32>
    %102 = vector.shape_cast %101 : vector<1xf32> to vector<1x1x1xf32>
    %103 = vector.extract %102[0, 0, 0] : f32 from vector<1x1x1xf32>
    %cst_55 = arith.constant 0.000000e+00 : f32
    %104 = arith.subf %cst_55, %98 : f32
    %cst_56 = arith.constant 9.99999996E-13 : f32
    %105 = arith.maximumf %103, %cst_56 : f32
    %106 = arith.divf %104, %105 : f32
    %c9_i32_57 = arith.constant 9 : i32
    %107 = vector.broadcast %c9_i32_57 : i32 to vector<16x15xi32>
    %108 = arith.cmpi sge, %69, %107 : vector<16x15xi32>
    %109 = arith.extui %108 : vector<16x15xi1> to vector<16x15xi32>
    %110 = arith.sitofp %109 : vector<16x15xi32> to vector<16x15xf32>
    %111 = arith.mulf %68, %110 : vector<16x15xf32>
    %112 = vector.shape_cast %111 : vector<16x15xf32> to vector<1x16x15xf32>
    %cst_58 = arith.constant dense<0.000000e+00> : vector<1xf32>
    %113 = vector.multi_reduction <add>, %112, %cst_58 [1, 2] : vector<1x16x15xf32> to vector<1xf32>
    %114 = vector.shape_cast %113 : vector<1xf32> to vector<1x1x1xf32>
    %115 = vector.extract %114[0, 0, 0] : f32 from vector<1x1x1xf32>
    %116 = arith.mulf %67, %110 : vector<16x15xf32>
    %117 = vector.shape_cast %116 : vector<16x15xf32> to vector<1x16x15xf32>
    %cst_59 = arith.constant dense<0.000000e+00> : vector<1xf32>
    %118 = vector.multi_reduction <add>, %117, %cst_59 [1, 2] : vector<1x16x15xf32> to vector<1xf32>
    %119 = vector.shape_cast %118 : vector<1xf32> to vector<1x1x1xf32>
    %120 = vector.extract %119[0, 0, 0] : f32 from vector<1x1x1xf32>
    %cst_60 = arith.constant 0.000000e+00 : f32
    %121 = arith.subf %cst_60, %115 : f32
    %cst_61 = arith.constant 9.99999996E-13 : f32
    %122 = arith.maximumf %120, %cst_61 : f32
    %123 = arith.divf %121, %122 : f32
    %124 = arith.addf %123, %86 : f32
    %125 = arith.addf %124, %106 : f32
    %cst_62 = arith.constant 3.000000e+00 : f32
    %126 = arith.divf %125, %cst_62 : f32
    %127 = tpu.iota {dimensions = array<i32: 1>} : vector<1x4xi32>
    %c0_i32_63 = arith.constant 0 : i32
    %128 = vector.broadcast %c0_i32_63 : i32 to vector<1x4xi32>
    %129 = arith.cmpi eq, %127, %128 : vector<1x4xi32>
    %130 = arith.extui %129 : vector<1x4xi1> to vector<1x4xi32>
    %131 = arith.sitofp %130 : vector<1x4xi32> to vector<1x4xf32>
    %132 = vector.broadcast %123 : f32 to vector<1x4xf32>
    %133 = arith.mulf %132, %131 : vector<1x4xf32>
    %c1_i32 = arith.constant 1 : i32
    %134 = vector.broadcast %c1_i32 : i32 to vector<1x4xi32>
    %135 = arith.cmpi eq, %127, %134 : vector<1x4xi32>
    %136 = arith.extui %135 : vector<1x4xi1> to vector<1x4xi32>
    %137 = arith.sitofp %136 : vector<1x4xi32> to vector<1x4xf32>
    %138 = vector.broadcast %86 : f32 to vector<1x4xf32>
    %139 = arith.mulf %138, %137 : vector<1x4xf32>
    %140 = arith.addf %133, %139 : vector<1x4xf32>
    %c2_i32 = arith.constant 2 : i32
    %141 = vector.broadcast %c2_i32 : i32 to vector<1x4xi32>
    %142 = arith.cmpi eq, %127, %141 : vector<1x4xi32>
    %143 = arith.extui %142 : vector<1x4xi1> to vector<1x4xi32>
    %144 = arith.sitofp %143 : vector<1x4xi32> to vector<1x4xf32>
    %145 = vector.broadcast %106 : f32 to vector<1x4xf32>
    %146 = arith.mulf %145, %144 : vector<1x4xf32>
    %147 = arith.addf %140, %146 : vector<1x4xf32>
    %c3_i32_64 = arith.constant 3 : i32
    %148 = vector.broadcast %c3_i32_64 : i32 to vector<1x4xi32>
    %149 = arith.cmpi eq, %127, %148 : vector<1x4xi32>
    %150 = arith.extui %149 : vector<1x4xi1> to vector<1x4xi32>
    %151 = arith.sitofp %150 : vector<1x4xi32> to vector<1x4xf32>
    %152 = vector.broadcast %126 : f32 to vector<1x4xf32>
    %153 = arith.mulf %152, %151 : vector<1x4xf32>
    %154 = arith.addf %147, %153 : vector<1x4xf32>
    %c0_65 = arith.constant 0 : index
    %c0_66 = arith.constant 0 : index
    %155 = vector.load %arg18[%c0_65, %c0_66] : memref<1x4xf32, #tpu.memory_space<vmem>>, vector<1x4xf32>
    tpu.vector_store %arg18[%c0_65, %c0_66], %154 {strides = array<i32>} : memref<1x4xf32, #tpu.memory_space<vmem>>, vector<1x4xf32>,
    return
  }
}

</mosaic_0001>

<bundles_post_ra>
// kernel: _device_forward.1
= control target key start
LH: loop header
LB: loop body
LE: loop exit
PB: predicated region body
PF: predicated region fallthrough
CT: control target
= control target key end

     0   :  { %s7114_s0 = inlined_call_operand.vmem [shape: bf16[16,768], index: 0, kind: input, shape index: {}]   ;;  %s7115_s1 = inlined_call_operand.vmem [shape: bf16[16,768], index: 1, kind: input, shape index: {}]   ;;  %s7116_s2 = inlined_call_operand.vmem [shape: bf16[16,2048], index: 2, kind: input, shape index: {}]   ;;  %s7117_s3 = inlined_call_operand.vmem [shape: bf16[768,256], index: 3, kind: input, shape index: {}]   ;;  %s7118_s4 = inlined_call_operand.vmem [shape: f32[1,256], index: 4, kind: input, shape index: {}]   ;;  %s7119_s5 = inlined_call_operand.vmem [shape: bf16[768,256], index: 5, kind: input, shape index: {}]   ;;  %s7120_s6 = inlined_call_operand.vmem [shape: f32[1,256], index: 6, kind: input, shape index: {}]   ;;  %s7121_s7 = inlined_call_operand.hbm [shape: bf16[2048,256], index: 7, kind: input, shape index: {}]   ;;  %s7122_s8 = inlined_call_operand.vmem [shape: f32[1,256], index: 8, kind: input, shape index: {}]   ;;  %s7123_s9 = inlined_call_operand.vmem [shape: bf16[256,15], index: 9, kind: input, shape index: {}]   ;;  %s7124_s10 = inlined_call_operand.vmem [shape: bf16[256,15], index: 10, kind: input, shape index: {}]   ;;  %s7125_s11 = inlined_call_operand.vmem [shape: bf16[256,15], index: 11, kind: input, shape index: {}]   ;;  %s7126_s12 = inlined_call_operand.vmem [shape: f32[1,15], index: 12, kind: input, shape index: {}]   ;;  %s7127_s13 = inlined_call_operand.vmem [shape: f32[15,15], index: 13, kind: input, shape index: {}]   ;;  %s7128_s14 = inlined_call_operand.vmem [shape: s32[1,15], index: 14, kind: input, shape index: {}]   ;;  %s7129_s15 = inlined_call_operand.vmem [shape: f32[1,15], index: 15, kind: input, shape index: {}]   ;;  %s7130_s16 = inlined_call_operand.vmem [shape: s32[16,15], index: 16, kind: input, shape index: {}]   ;;  %s7131_s17 = inlined_call_operand.vmem [shape: f32[16,15], index: 17, kind: output, shape index: {0}]   ;;  %s7132_s18 = inlined_call_operand.vmem [shape: f32[1,4], index: 18, kind: output, shape index: {1}]  }
   0x1   :  { %7136 = sst [smem:[#allocation5_spill]] %s7114_s0 }
   0x2   :  { %7137 = sst [smem:[#allocation6_spill]] %s7115_s1 }
   0x3   :  { %7138 = sst [smem:[#allocation7_spill]] %s7116_s2 }
   0x4   :  { %24 = vsyncpa [#allocation3], 0  ;;  %s5990_s27 = smov [#allocation2]   ;;  %s5966_s0 = scalar_lea.hbm %s7121_s7, 32768 }
   0x5   :  { %s44_s28 = sshll.u32 %s5990_s27, 4  ;;  %p5967_p0 = scmp.ne.s32.totalorder %s7121_s7, %s5966_s0  ;;  %s45_s28 = int_to_ptr.vmem [resolvable:$true] %s44_s28 }
   0x6   :  { %p5970_p1 = scmp.lt.u32.totalorder %s5966_s0, %s7121_s7 }
   0x8   :  { %p5972_p2 = pnand %p5970_p1, %p5967_p0 }
   0xa   :  { %5975 = shalt.err (!%p5972_p2)
}
   0xb   :  { %s5976_s22 = scalar_lea.vmem %s45_s28, 32768  ;;  %p5981_p4 = scmp.lt.s32.totalorder %s45_s28, %s45_s28 }
   0xc   :  { %p5977_p3 = scmp.ne.s32.totalorder %s45_s28, %s5976_s22  ;;  %p5982_p5 = scmp.lt.s32.totalorder %s5976_s22, %s5976_s22 }
   0xe   :  { %p5983_p6 = por %p5982_p5, %p5981_p4 }
  0x10   :  { %p5984_p7 = pnand %p5983_p6, %p5977_p3 }
  0x12   :  { %5987 = shalt.err (!%p5984_p7)
}
  0x13   :  { %s5991_s2 = smov 128   ;;  %s5992_s23 = smov 8  }
  0x14   :  { %50 = dma.hbm_to_vmem [thread:$0]  %s7121_s7, 32768, %s45_s28, [#allocation3], %s5991_s2, %s5991_s2, %s5992_s23  }
  0x15   :  { %5988 = dma.done.wait [#allocation3], 32768  }
  0x16   :  { %5989 = vsyncadd [#allocation3], 4294934528  ;;  %v5202_v0 = vld [vmem:[%s7117_s3 + $0x4] ss:$8 sps:$4 sm:$0xff]   ;;  %v5206_v2 = vld [vmem:[%s7117_s3] ss:$8 sps:$4 sm:$0xff]  }
  0x17   :  { %v5204_v1 = vld [vmem:[#allocation2 + $0x4] ss:$8 sps:$4 sm:$0xff]   ;;  %697 = vmatprep.subr.bf16.mxu1 %v5202_v0  ;;  %v5207_v3 = vld [vmem:[#allocation2] ss:$8 sps:$4 sm:$0xff]   ;;  %v5210_v5 = vld [vmem:[#allocation2 + $0x14] ss:$8 sps:$4 sm:$0xff]  }
  0x18   :  { %3223 = vmatprep.subr.bf16.mxu0 %v5204_v1  ;;  %v5208_v4 = vld [vmem:[%s7117_s3 + $0x14] ss:$8 sps:$4 sm:$0xff]   ;;  %698 = vmatpush1.bf16.msra.mxu1 %v5206_v2  ;;  %v5212_v6 = vld [vmem:[%s7117_s3 + $0x10] ss:$8 sps:$4 sm:$0xff]   ;;  %v5214_v8 = vld [vmem:[%s7117_s3 + $0x24] ss:$8 sps:$4 sm:$0xff]  }
  0x19   :  { %3224 = vmatpush1.bf16.msra.mxu0 %v5207_v3  ;;  %699 = vmatprep.subr.bf16.mxu1 %v5208_v4  ;;  %v5213_v7 = vld [vmem:[#allocation2 + $0x10] ss:$8 sps:$4 sm:$0xff]   ;;  %v5216_v9 = vld [vmem:[#allocation2 + $0x24] ss:$8 sps:$4 sm:$0xff]   ;;  %v5219_v11 = vld [vmem:[#allocation2 + $0x20] ss:$8 sps:$4 sm:$0xff]  }
  0x1a   :  { %3225 = vmatprep.subr.bf16.mxu0 %v5210_v5  ;;  %v5218_v10 = vld [vmem:[%s7117_s3 + $0x20] ss:$8 sps:$4 sm:$0xff]   ;;  %v5220_v12 = vld [vmem:[%s7117_s3 + $0x34] ss:$8 sps:$4 sm:$0xff]   ;;  %v5224_v14 = vld [vmem:[%s7117_s3 + $0x30] ss:$8 sps:$4 sm:$0xff]  }
  0x1b   :  { %v5222_v13 = vld [vmem:[#allocation2 + $0x34] ss:$8 sps:$4 sm:$0xff]   ;;  %v5225_v15 = vld [vmem:[#allocation2 + $0x30] ss:$8 sps:$4 sm:$0xff]   ;;  %v5228_v17 = vld [vmem:[#allocation2 + $0x44] ss:$8 sps:$4 sm:$0xff]  }
  0x1c   :  { %700 = vmatpush1.bf16.msra.mxu1 %v5212_v6  ;;  %v5226_v16 = vld [vmem:[%s7117_s3 + $0x44] ss:$8 sps:$4 sm:$0xff]   ;;  %v5230_v18 = vld [vmem:[%s7117_s3 + $0x40] ss:$8 sps:$4 sm:$0xff]   ;;  %v5232_v20 = vld [vmem:[%s7117_s3 + $0x54] ss:$8 sps:$4 sm:$0xff]  }
  0x1d   :  { %3226 = vmatpush1.bf16.msra.mxu0 %v5213_v7  ;;  %701 = vmatprep.subr.bf16.mxu1 %v5214_v8  ;;  %v5231_v19 = vld [vmem:[#allocation2 + $0x40] ss:$8 sps:$4 sm:$0xff]   ;;  %v5234_v21 = vld [vmem:[#allocation2 + $0x54] ss:$8 sps:$4 sm:$0xff]   ;;  %v5237_v23 = vld [vmem:[#allocation2 + $0x50] ss:$8 sps:$4 sm:$0xff]  }
  0x1e   :  { %3227 = vmatprep.subr.bf16.mxu0 %v5216_v9  ;;  %v5236_v22 = vld [vmem:[%s7117_s3 + $0x50] ss:$8 sps:$4 sm:$0xff]   ;;  %v5238_v24 = vld [vmem:[%s7117_s3 + $0x64] ss:$8 sps:$4 sm:$0xff]   ;;  %v5242_v26 = vld [vmem:[%s7117_s3 + $0x60] ss:$8 sps:$4 sm:$0xff]  }
  0x1f   :  { %v5240_v25 = vld [vmem:[#allocation2 + $0x64] ss:$8 sps:$4 sm:$0xff]   ;;  %v5243_v27 = vld [vmem:[#allocation2 + $0x60] ss:$8 sps:$4 sm:$0xff]   ;;  %v5246_v29 = vld [vmem:[#allocation2 + $0x74] ss:$8 sps:$4 sm:$0xff]  }
  0x20   :  { %702 = vmatpush1.bf16.msra.mxu1 %v5218_v10  ;;  %v5244_v28 = vld [vmem:[%s7117_s3 + $0x74] ss:$8 sps:$4 sm:$0xff]   ;;  %v5248_v30 = vld [vmem:[%s7117_s3 + $0x70] ss:$8 sps:$4 sm:$0xff]   ;;  %v5250_v32 = vld [vmem:[%s7117_s3 + $0x84] ss:$8 sps:$4 sm:$0xff]  }
  0x21   :  { %3228 = vmatpush1.bf16.msra.mxu0 %v5219_v11  ;;  %703 = vmatprep.subr.bf16.mxu1 %v5220_v12  ;;  %v5249_v31 = vld [vmem:[#allocation2 + $0x70] ss:$8 sps:$4 sm:$0xff]   ;;  %v5252_v33 = vld [vmem:[#allocation2 + $0x84] ss:$8 sps:$4 sm:$0xff]   ;;  %v5255_v35 = vld [vmem:[#allocation2 + $0x80] ss:$8 sps:$4 sm:$0xff]  }
  0x22   :  { %3229 = vmatprep.subr.bf16.mxu0 %v5222_v13  ;;  %v5254_v34 = vld [vmem:[%s7117_s3 + $0x80] ss:$8 sps:$4 sm:$0xff]   ;;  %v5256_v36 = vld [vmem:[%s7117_s3 + $0x94] ss:$8 sps:$4 sm:$0xff]   ;;  %v5260_v38 = vld [vmem:[%s7117_s3 + $0x90] ss:$8 sps:$4 sm:$0xff]  }
  0x23   :  { %v5258_v37 = vld [vmem:[#allocation2 + $0x94] ss:$8 sps:$4 sm:$0xff]   ;;  %v5261_v39 = vld [vmem:[#allocation2 + $0x90] ss:$8 sps:$4 sm:$0xff]   ;;  %v5264_v41 = vld [vmem:[#allocation2 + $0xa4] ss:$8 sps:$4 sm:$0xff]  }
  0x24   :  { %704 = vmatpush1.bf16.msra.mxu1 %v5224_v14  ;;  %v5262_v40 = vld [vmem:[%s7117_s3 + $0xa4] ss:$8 sps:$4 sm:$0xff]   ;;  %v5266_v42 = vld [vmem:[%s7117_s3 + $0xa0] ss:$8 sps:$4 sm:$0xff]   ;;  %v5268_v44 = vld [vmem:[%s7117_s3 + $0xb4] ss:$8 sps:$4 sm:$0xff]  }
  0x25   :  { %3230 = vmatpush1.bf16.msra.mxu0 %v5225_v15  ;;  %705 = vmatprep.subr.bf16.mxu1 %v5226_v16  ;;  %v5267_v43 = vld [vmem:[#allocation2 + $0xa0] ss:$8 sps:$4 sm:$0xff]   ;;  %v5270_v45 = vld [vmem:[#allocation2 + $0xb4] ss:$8 sps:$4 sm:$0xff]   ;;  %v5273_v47 = vld [vmem:[#allocation2 + $0xb0] ss:$8 sps:$4 sm:$0xff]  }
  0x26   :  { %3231 = vmatprep.subr.bf16.mxu0 %v5228_v17  ;;  %v5272_v46 = vld [vmem:[%s7117_s3 + $0xb0] ss:$8 sps:$4 sm:$0xff]   ;;  %s7139_s29 = sld [smem:[#allocation5_spill]]  ;;  %v5274_v49 = vld [vmem:[%s7117_s3 + $0xc4] ss:$8 sps:$4 sm:$0xff]   ;;  %s7140_s28 = sld [smem:[#allocation7_spill]] }
  0x27   :  { %v5276_v50 = vld [vmem:[#allocation2 + $0xc4] ss:$8 sps:$4 sm:$0xff]   ;;  %v5278_v54 = vld [vmem:[%s7117_s3 + $0xc0] ss:$8 sps:$4 sm:$0xff]   ;;  %v5282_v57 = vld [vmem:[#allocation2 + $0xd4] ss:$8 sps:$4 sm:$0xff]  }
  0x28   :  { %706 = vmatpush1.bf16.msra.mxu1 %v5230_v18  ;;  %v5279_v55 = vld [vmem:[#allocation2 + $0xc0] ss:$8 sps:$4 sm:$0xff]   ;;  %v5280_v56 = vld [vmem:[%s7117_s3 + $0xd4] ss:$8 sps:$4 sm:$0xff]   ;;  %v5285_v59 = vld [vmem:[#allocation2 + $0xd0] ss:$8 sps:$4 sm:$0xff]  }
  0x29   :  { %3232 = vmatpush1.bf16.msra.mxu0 %v5231_v19  ;;  %707 = vmatprep.subr.bf16.mxu1 %v5232_v20  ;;  %v5284_v58 = vld [vmem:[%s7117_s3 + $0xd0] ss:$8 sps:$4 sm:$0xff]   ;;  %v5286_v60 = vld [vmem:[%s7117_s3 + $0xe4] ss:$8 sps:$4 sm:$0xff]   ;;  %v5290_v62 = vld [vmem:[%s7117_s3 + $0xe0] ss:$8 sps:$4 sm:$0xff]  }
  0x2a   :  { %3233 = vmatprep.subr.bf16.mxu0 %v5234_v21  ;;  %v5288_v61 = vld [vmem:[#allocation2 + $0xe4] ss:$8 sps:$4 sm:$0xff]   ;;  %v5291_v63 = vld [vmem:[#allocation2 + $0xe0] ss:$8 sps:$4 sm:$0xff]   ;;  %v5294_v1 = vld [vmem:[#allocation2 + $0xf4] ss:$8 sps:$4 sm:$0xff]  }
  0x2b   :  { %v5292_v0 = vld [vmem:[%s7117_s3 + $0xf4] ss:$8 sps:$4 sm:$0xff]   ;;  %v5296_v2 = vld [vmem:[%s7117_s3 + $0xf0] ss:$8 sps:$4 sm:$0xff]   ;;  %v5303_v4 = vld [vmem:[%s7117_s3 + $0x104] ss:$8 sps:$4 sm:$0xff]  }
  0x2c   :  { %708 = vmatpush1.bf16.msra.mxu1 %v5236_v22  ;;  %v5300_v48 = vld [vmem:[%s7139_s29 + $0x4] ss:$24 sps:$4 sm:$0xff]   ;;  %v5297_v3 = vld [vmem:[#allocation2 + $0xf0] ss:$8 sps:$4 sm:$0xff]   ;;  %v5306_v5 = vld [vmem:[#allocation2 + $0x104] ss:$8 sps:$4 sm:$0xff]  }
  0x2d   :  { %3234 = vmatpush1.bf16.msra.mxu0 %v5237_v23  ;;  %709 = vmatprep.subr.bf16.mxu1 %v5238_v24  ;;  %v1579_v51 = vld [vmem:[%s7140_s28] sm:$0xff]  ;;  %v5304_v9 = vld [vmem:[#allocation2 + $0x100] ss:$8 sps:$4 sm:$0xff]   ;;  %v5309_v10 = vld [vmem:[%s7117_s3 + $0x114] ss:$8 sps:$4 sm:$0xff]   ;;  %s7141_s2 = sld [smem:[#allocation6_spill]] }
  0x2e   :  { %3235 = vmatprep.subr.bf16.mxu0 %v5240_v25  ;;  %v1587_v52 = vld [vmem:[%s7140_s28 + $0x40] sm:$0xff]  ;;  %729 = vmatprep.mubr.bf16.mxu1 %v5300_v48  ;;  %v5307_v12 = vld [vmem:[%s7117_s3 + $0x110] ss:$8 sps:$4 sm:$0xff]   ;;  %v5318_v15 = vld [vmem:[#allocation2 + $0x124] ss:$8 sps:$4 sm:$0xff]   ;;  %vm4093_vm0 = vcmask 121856  }
  0x2f   :  { %v4687_v53 = vcombine.high %v1579_v51, %v1587_v52  ;;  %v5298_v6 = vld [vmem:[%s7139_s29] ss:$24 sps:$4 sm:$0xff]   ;;  %v4686_v7 = vcombine.low %v1579_v51, %v1587_v52  ;;  %v5312_v11 = vld [vmem:[#allocation2 + $0x114] ss:$8 sps:$4 sm:$0xff]   ;;  %v5316_v17 = vld [vmem:[#allocation2 + $0x120] ss:$8 sps:$4 sm:$0xff]  }
  0x30   :  { %710 = vmatpush1.bf16.msra.mxu1 %v5242_v26  ;;  %v5301_v8 = vld [vmem:[%s7117_s3 + $0x100] ss:$8 sps:$4 sm:$0xff]   ;;  %v5315_v14 = vld [vmem:[%s7117_s3 + $0x124] ss:$8 sps:$4 sm:$0xff]   ;;  %v5321_v18 = vld [vmem:[%s7117_s3 + $0x134] ss:$8 sps:$4 sm:$0xff]  }
  0x31   :  { %3236 = vmatpush1.bf16.msra.mxu0 %v5243_v27  ;;  %711 = vmatprep.subr.bf16.mxu1 %v5244_v28  ;;  %v5310_v13 = vld [vmem:[#allocation2 + $0x110] ss:$8 sps:$4 sm:$0xff]   ;;  %v5324_v19 = vld [vmem:[#allocation2 + $0x134] ss:$8 sps:$4 sm:$0xff]   ;;  %v5330_v23 = vld [vmem:[#allocation2 + $0x144] ss:$8 sps:$4 sm:$0xff]  }
  0x32   :  { %3237 = vmatprep.subr.bf16.mxu0 %v5246_v29  ;;  %3255 = vmatprep.mubr.bf16.mxu0 %v4687_v53  ;;  %v5313_v16 = vld [vmem:[%s7117_s3 + $0x120] ss:$8 sps:$4 sm:$0xff]   ;;  %v5319_v20 = vld [vmem:[%s7117_s3 + $0x130] ss:$8 sps:$4 sm:$0xff]   ;;  %v5327_v22 = vld [vmem:[%s7117_s3 + $0x144] ss:$8 sps:$4 sm:$0xff]  }
  0x33   :  { %v5322_v21 = vld [vmem:[#allocation2 + $0x130] ss:$8 sps:$4 sm:$0xff]   ;;  %v5328_v25 = vld [vmem:[#allocation2 + $0x140] ss:$8 sps:$4 sm:$0xff]   ;;  %v5333_v26 = vld [vmem:[%s7117_s3 + $0x154] ss:$8 sps:$4 sm:$0xff]  }
  0x34   :  { %712 = vmatpush1.bf16.msra.mxu1 %v5248_v30  ;;  %v5325_v24 = vld [vmem:[%s7117_s3 + $0x140] ss:$8 sps:$4 sm:$0xff]   ;;  %v5336_v27 = vld [vmem:[#allocation2 + $0x154] ss:$8 sps:$4 sm:$0xff]   ;;  %v5331_v28 = vld [vmem:[%s7117_s3 + $0x150] ss:$8 sps:$4 sm:$0xff]  }
  0x35   :  { %3238 = vmatpush1.bf16.msra.mxu0 %v5249_v31  ;;  %713 = vmatprep.subr.bf16.mxu1 %v5250_v32  ;;  %v5334_v29 = vld [vmem:[#allocation2 + $0x150] ss:$8 sps:$4 sm:$0xff]   ;;  %v5339_v30 = vld [vmem:[%s7117_s3 + $0x164] ss:$8 sps:$4 sm:$0xff]   ;;  %v5364_v53 = vld [vmem:[#allocation2 + $0x1a0] ss:$8 sps:$4 sm:$0xff]  }
  0x36   :  { %3239 = vmatprep.subr.bf16.mxu0 %v5252_v33  ;;  %v5342_v31 = vld [vmem:[#allocation2 + $0x164] ss:$8 sps:$4 sm:$0xff]   ;;  %v5337_v32 = vld [vmem:[%s7117_s3 + $0x160] ss:$8 sps:$4 sm:$0xff]   ;;  %v5355_v48 = vld [vmem:[%s7117_s3 + $0x190] ss:$8 sps:$4 sm:$0xff]  }
  0x37   :  { %v5340_v33 = vld [vmem:[#allocation2 + $0x160] ss:$8 sps:$4 sm:$0xff]   ;;  %v5366_v51 = vld [vmem:[#allocation2 + $0x1a4] ss:$8 sps:$4 sm:$0xff]   ;;  %vm4112_vm1 = vcmask 1046528   ;;  %vm5993_vm2 = vmmov 1  }
  0x38   :  { %714 = vmatpush1.bf16.msra.mxu1 %v5254_v34  ;;  %v5399_v34 = vld [vmem:[%s7139_s29 + $0xc] ss:$24 sps:$4 sm:$0xff]   ;;  %v5361_v52 = vld [vmem:[%s7117_s3 + $0x1a0] ss:$8 sps:$4 sm:$0xff]   ;;  %vm7012_vm3 = vmpackc.low %vm4112_vm1, %vm5993_vm2 }
  0x39   :  { %3240 = vmatpush1.bf16.msra.mxu0 %v5255_v35  ;;  %715 = vmatprep.subr.bf16.mxu1 %v5256_v36  ;;  %v5345_v35 = vld [vmem:[%s7117_s3 + $0x174] ss:$8 sps:$4 sm:$0xff]  }
  0x3a   :  { %3241 = vmatprep.subr.bf16.mxu0 %v5258_v37  ;;  %v5348_v36 = vld [vmem:[#allocation2 + $0x174] ss:$8 sps:$4 sm:$0xff]   ;;  %v6262_v37 = vld [vmem:[%s7140_s28 + $0x8] sm:$0xff] }
  0x3c   :  { %716 = vmatpush1.bf16.msra.mxu1 %v5260_v38  ;;  %v6267_v38 = vld [vmem:[%s7140_s28 + $0x48] sm:$0xff] }
  0x3d   :  { %3242 = vmatpush1.bf16.msra.mxu0 %v5261_v39  ;;  %717 = vmatprep.subr.bf16.mxu1 %v5262_v40  ;;  %v5343_v39 = vld [vmem:[%s7117_s3 + $0x170] ss:$8 sps:$4 sm:$0xff]  }
  0x3e   :  { %3243 = vmatprep.subr.bf16.mxu0 %v5264_v41  ;;  %v5346_v40 = vld [vmem:[#allocation2 + $0x170] ss:$8 sps:$4 sm:$0xff]   ;;  %v4689_v41 = vcombine.high %v6262_v37, %v6267_v38 }
  0x40   :  { %718 = vmatpush1.bf16.msra.mxu1 %v5266_v42  ;;  %v5351_v42 = vld [vmem:[%s7117_s3 + $0x184] ss:$8 sps:$4 sm:$0xff]  }
  0x41   :  { %3244 = vmatpush1.bf16.msra.mxu0 %v5267_v43  ;;  %719 = vmatprep.subr.bf16.mxu1 %v5268_v44  ;;  %v5354_v43 = vld [vmem:[#allocation2 + $0x184] ss:$8 sps:$4 sm:$0xff]   ;;  %v5349_v44 = vld [vmem:[%s7117_s3 + $0x180] ss:$8 sps:$4 sm:$0xff]  }
  0x42   :  { %3245 = vmatprep.subr.bf16.mxu0 %v5270_v45  ;;  %v5352_v45 = vld [vmem:[#allocation2 + $0x180] ss:$8 sps:$4 sm:$0xff]  }
  0x44   :  { %720 = vmatpush1.bf16.msra.mxu1 %v5272_v46  ;;  %v5357_v46 = vld [vmem:[%s7117_s3 + $0x194] ss:$8 sps:$4 sm:$0xff]  }
  0x45   :  { %3246 = vmatpush1.bf16.msra.mxu0 %v5273_v47  ;;  %721 = vmatprep.subr.bf16.mxu1 %v5274_v49  ;;  %v5360_v47 = vld [vmem:[#allocation2 + $0x194] ss:$8 sps:$4 sm:$0xff]   ;;  %v5358_v49 = vld [vmem:[#allocation2 + $0x190] ss:$8 sps:$4 sm:$0xff]  }
  0x46   :  { %3247 = vmatprep.subr.bf16.mxu0 %v5276_v50  ;;  %v5363_v50 = vld [vmem:[%s7117_s3 + $0x1a4] ss:$8 sps:$4 sm:$0xff]  }
  0x48   :  { %722 = vmatpush1.bf16.msra.mxu1 %v5278_v54  ;;  %v5369_v54 = vld [vmem:[%s7117_s3 + $0x1b4] ss:$8 sps:$4 sm:$0xff]  }
  0x49   :  { %3248 = vmatpush1.bf16.msra.mxu0 %v5279_v55  ;;  %723 = vmatprep.subr.bf16.mxu1 %v5280_v56  ;;  %v5372_v55 = vld [vmem:[#allocation2 + $0x1b4] ss:$8 sps:$4 sm:$0xff]   ;;  %v5367_v56 = vld [vmem:[%s7117_s3 + $0x1b0] ss:$8 sps:$4 sm:$0xff]  }
  0x4a   :  { %3249 = vmatprep.subr.bf16.mxu0 %v5282_v57  ;;  %v5370_v57 = vld [vmem:[#allocation2 + $0x1b0] ss:$8 sps:$4 sm:$0xff]  }
  0x4c   :  { %724 = vmatpush1.bf16.msra.mxu1 %v5284_v58  ;;  %v5375_v58 = vld [vmem:[%s7117_s3 + $0x1c4] ss:$8 sps:$4 sm:$0xff]  }
  0x4d   :  { %3250 = vmatpush1.bf16.msra.mxu0 %v5285_v59  ;;  %725 = vmatprep.subr.bf16.mxu1 %v5286_v60  ;;  %v5378_v59 = vld [vmem:[#allocation2 + $0x1c4] ss:$8 sps:$4 sm:$0xff]   ;;  %v5373_v60 = vld [vmem:[%s7117_s3 + $0x1c0] ss:$8 sps:$4 sm:$0xff]  }
  0x4e   :  { %3251 = vmatprep.subr.bf16.mxu0 %v5288_v61  ;;  %v5376_v61 = vld [vmem:[#allocation2 + $0x1c0] ss:$8 sps:$4 sm:$0xff]  }
  0x50   :  { %726 = vmatpush1.bf16.msra.mxu1 %v5290_v62  ;;  %v5381_v62 = vld [vmem:[%s7117_s3 + $0x1d4] ss:$8 sps:$4 sm:$0xff]  }
  0x51   :  { %3252 = vmatpush1.bf16.msra.mxu0 %v5291_v63  ;;  %727 = vmatprep.subr.bf16.mxu1 %v5292_v0  ;;  %v5384_v63 = vld [vmem:[#allocation2 + $0x1d4] ss:$8 sps:$4 sm:$0xff]   ;;  %v5379_v0 = vld [vmem:[%s7117_s3 + $0x1d0] ss:$8 sps:$4 sm:$0xff]  }
  0x52   :  { %3253 = vmatprep.subr.bf16.mxu0 %v5294_v1  ;;  %v5382_v1 = vld [vmem:[#allocation2 + $0x1d0] ss:$8 sps:$4 sm:$0xff]  }
  0x54   :  { %728 = vmatpush1.bf16.msra.mxu1 %v5296_v2  ;;  %v5387_v2 = vld [vmem:[%s7117_s3 + $0x1e4] ss:$8 sps:$4 sm:$0xff]  }
  0x55   :  { %3254 = vmatpush1.bf16.msra.mxu0 %v5297_v3  ;;  %740 = vmatprep.subr.bf16.mxu1 %v5303_v4  ;;  %v5390_v3 = vld [vmem:[#allocation2 + $0x1e4] ss:$8 sps:$4 sm:$0xff]   ;;  %v5385_v4 = vld [vmem:[%s7117_s3 + $0x1e0] ss:$8 sps:$4 sm:$0xff]  }
  0x56   :  { %3266 = vmatprep.subr.bf16.mxu0 %v5306_v5  ;;  %v5388_v5 = vld [vmem:[#allocation2 + $0x1e0] ss:$8 sps:$4 sm:$0xff]  }
  0x57   :  { %730 = vmatmul.mubr.bf16.vlgmr.msra.gmra.mrb[0].mxu1 %v5298_v6  ;;  %v5393_v6 = vld [vmem:[%s7117_s3 + $0x1f4] ss:$8 sps:$4 sm:$0xff]  }
  0x58   :  { %3256 = vmatmul.mubr.bf16.vlgmr.msra.gmra.mrb[0].mxu0 %v4686_v7  ;;  %741 = vmatpush1.bf16.msra.mxu1 %v5301_v8  ;;  %v5396_v7 = vld [vmem:[#allocation2 + $0x1f4] ss:$8 sps:$4 sm:$0xff]   ;;  %v5391_v8 = vld [vmem:[%s7117_s3 + $0x1f0] ss:$8 sps:$4 sm:$0xff]  }
  0x59   :  { %3267 = vmatpush1.bf16.msra.mxu0 %v5304_v9  ;;  %742 = vmatprep.subr.bf16.mxu1 %v5309_v10  ;;  %v5394_v9 = vld [vmem:[#allocation2 + $0x1f0] ss:$8 sps:$4 sm:$0xff]   ;;  %v5402_v10 = vld [vmem:[%s7117_s3 + $0x204] ss:$8 sps:$4 sm:$0xff]  }
  0x5a   :  { %3268 = vmatprep.subr.bf16.mxu0 %v5312_v11  ;;  %772 = vmatprep.mubr.bf16.mxu1 %v5399_v34  ;;  %v5405_v11 = vld [vmem:[#allocation2 + $0x204] ss:$8 sps:$4 sm:$0xff]   ;;  %v5424_v34 = vld [vmem:[%s7117_s3 + $0x240] ss:$8 sps:$4 sm:$0xff]  }
  0x5b   :  { %3298 = vmatprep.mubr.bf16.mxu0 %v4689_v41  ;;  %v5441_v41 = vld [vmem:[#allocation2 + $0x264] ss:$8 sps:$4 sm:$0xff]  }
  0x5c   :  { %743 = vmatpush1.bf16.msra.mxu1 %v5307_v12  ;;  %v5397_v12 = vld [vmem:[%s7139_s29 + $0x8] ss:$24 sps:$4 sm:$0xff]  }
  0x5d   :  { %3269 = vmatpush1.bf16.msra.mxu0 %v5310_v13  ;;  %744 = vmatprep.subr.bf16.mxu1 %v5315_v14  ;;  %v5400_v13 = vld [vmem:[%s7117_s3 + $0x200] ss:$8 sps:$4 sm:$0xff]   ;;  %v4688_v14 = vcombine.low %v6262_v37, %v6267_v38  ;;  %v5435_v37 = vld [vmem:[#allocation2 + $0x254] ss:$8 sps:$4 sm:$0xff]   ;;  %v5430_v38 = vld [vmem:[%s7117_s3 + $0x250] ss:$8 sps:$4 sm:$0xff]  }
  0x5e   :  { %3270 = vmatprep.subr.bf16.mxu0 %v5318_v15  ;;  %v5403_v15 = vld [vmem:[#allocation2 + $0x200] ss:$8 sps:$4 sm:$0xff]  }
  0x60   :  { %745 = vmatpush1.bf16.msra.mxu1 %v5313_v16  ;;  %v5408_v16 = vld [vmem:[%s7117_s3 + $0x214] ss:$8 sps:$4 sm:$0xff]  }
  0x61   :  { %3271 = vmatpush1.bf16.msra.mxu0 %v5316_v17  ;;  %746 = vmatprep.subr.bf16.mxu1 %v5321_v18  ;;  %v5411_v17 = vld [vmem:[#allocation2 + $0x214] ss:$8 sps:$4 sm:$0xff]   ;;  %v5406_v18 = vld [vmem:[%s7117_s3 + $0x210] ss:$8 sps:$4 sm:$0xff]  }
  0x62   :  { %3272 = vmatprep.subr.bf16.mxu0 %v5324_v19  ;;  %v5409_v19 = vld [vmem:[#allocation2 + $0x210] ss:$8 sps:$4 sm:$0xff]  }
  0x64   :  { %747 = vmatpush1.bf16.msra.mxu1 %v5319_v20  ;;  %v5414_v20 = vld [vmem:[%s7117_s3 + $0x224] ss:$8 sps:$4 sm:$0xff]  }
  0x65   :  { %3273 = vmatpush1.bf16.msra.mxu0 %v5322_v21  ;;  %748 = vmatprep.subr.bf16.mxu1 %v5327_v22  ;;  %v5417_v21 = vld [vmem:[#allocation2 + $0x224] ss:$8 sps:$4 sm:$0xff]  }
  0x66   :  { %3274 = vmatprep.subr.bf16.mxu0 %v5330_v23  ;;  %v5498_v22 = vld [vmem:[%s7139_s29 + $0x14] ss:$24 sps:$4 sm:$0xff]  }
  0x67   :  { %v6348_v23 = vld [vmem:[%s7140_s28 + $0x10] sm:$0xff] }
  0x68   :  { %749 = vmatpush1.bf16.msra.mxu1 %v5325_v24  ;;  %v6353_v24 = vld [vmem:[%s7140_s28 + $0x50] sm:$0xff] }
  0x69   :  { %3275 = vmatpush1.bf16.msra.mxu0 %v5328_v25  ;;  %750 = vmatprep.subr.bf16.mxu1 %v5333_v26  ;;  %v5412_v25 = vld [vmem:[%s7117_s3 + $0x220] ss:$8 sps:$4 sm:$0xff]  }
  0x6a   :  { %3276 = vmatprep.subr.bf16.mxu0 %v5336_v27  ;;  %v5415_v26 = vld [vmem:[#allocation2 + $0x220] ss:$8 sps:$4 sm:$0xff]   ;;  %v4691_v27 = vcombine.high %v6348_v23, %v6353_v24 }
  0x6c   :  { %751 = vmatpush1.bf16.msra.mxu1 %v5331_v28  ;;  %v5420_v28 = vld [vmem:[%s7117_s3 + $0x234] ss:$8 sps:$4 sm:$0xff]  }
  0x6d   :  { %3277 = vmatpush1.bf16.msra.mxu0 %v5334_v29  ;;  %752 = vmatprep.subr.bf16.mxu1 %v5339_v30  ;;  %v5423_v29 = vld [vmem:[#allocation2 + $0x234] ss:$8 sps:$4 sm:$0xff]   ;;  %v5418_v30 = vld [vmem:[%s7117_s3 + $0x230] ss:$8 sps:$4 sm:$0xff]  }
  0x6e   :  { %3278 = vmatprep.subr.bf16.mxu0 %v5342_v31  ;;  %v5421_v31 = vld [vmem:[#allocation2 + $0x230] ss:$8 sps:$4 sm:$0xff]  }
  0x70   :  { %753 = vmatpush1.bf16.msra.mxu1 %v5337_v32  ;;  %v5426_v32 = vld [vmem:[%s7117_s3 + $0x244] ss:$8 sps:$4 sm:$0xff]  }
  0x71   :  { %3279 = vmatpush1.bf16.msra.mxu0 %v5340_v33  ;;  %754 = vmatprep.subr.bf16.mxu1 %v5345_v35  ;;  %v5429_v33 = vld [vmem:[#allocation2 + $0x244] ss:$8 sps:$4 sm:$0xff]   ;;  %v5427_v35 = vld [vmem:[#allocation2 + $0x240] ss:$8 sps:$4 sm:$0xff]  }
  0x72   :  { %3280 = vmatprep.subr.bf16.mxu0 %v5348_v36  ;;  %v5432_v36 = vld [vmem:[%s7117_s3 + $0x254] ss:$8 sps:$4 sm:$0xff]  }
  0x74   :  { %755 = vmatpush1.bf16.msra.mxu1 %v5343_v39  ;;  %v5433_v39 = vld [vmem:[#allocation2 + $0x250] ss:$8 sps:$4 sm:$0xff]  }
  0x75   :  { %3281 = vmatpush1.bf16.msra.mxu0 %v5346_v40  ;;  %756 = vmatprep.subr.bf16.mxu1 %v5351_v42  ;;  %v5438_v40 = vld [vmem:[%s7117_s3 + $0x264] ss:$8 sps:$4 sm:$0xff]   ;;  %v5436_v42 = vld [vmem:[%s7117_s3 + $0x260] ss:$8 sps:$4 sm:$0xff]  }
  0x76   :  { %3282 = vmatprep.subr.bf16.mxu0 %v5354_v43  ;;  %v5439_v43 = vld [vmem:[#allocation2 + $0x260] ss:$8 sps:$4 sm:$0xff]  }
  0x78   :  { %757 = vmatpush1.bf16.msra.mxu1 %v5349_v44  ;;  %v5444_v44 = vld [vmem:[%s7117_s3 + $0x274] ss:$8 sps:$4 sm:$0xff]  }
  0x79   :  { %3283 = vmatpush1.bf16.msra.mxu0 %v5352_v45  ;;  %758 = vmatprep.subr.bf16.mxu1 %v5357_v46  ;;  %v5447_v45 = vld [vmem:[#allocation2 + $0x274] ss:$8 sps:$4 sm:$0xff]   ;;  %v5442_v46 = vld [vmem:[%s7117_s3 + $0x270] ss:$8 sps:$4 sm:$0xff]  }
  0x7a   :  { %3284 = vmatprep.subr.bf16.mxu0 %v5360_v47  ;;  %v5445_v47 = vld [vmem:[#allocation2 + $0x270] ss:$8 sps:$4 sm:$0xff]  }
  0x7c   :  { %759 = vmatpush1.bf16.msra.mxu1 %v5355_v48  ;;  %v5450_v48 = vld [vmem:[%s7117_s3 + $0x284] ss:$8 sps:$4 sm:$0xff]  }
  0x7d   :  { %3285 = vmatpush1.bf16.msra.mxu0 %v5358_v49  ;;  %760 = vmatprep.subr.bf16.mxu1 %v5363_v50  ;;  %v5453_v49 = vld [vmem:[#allocation2 + $0x284] ss:$8 sps:$4 sm:$0xff]   ;;  %v5448_v50 = vld [vmem:[%s7117_s3 + $0x280] ss:$8 sps:$4 sm:$0xff]  }
  0x7e   :  { %3286 = vmatprep.subr.bf16.mxu0 %v5366_v51  ;;  %v5451_v51 = vld [vmem:[#allocation2 + $0x280] ss:$8 sps:$4 sm:$0xff]  }
  0x80   :  { %761 = vmatpush1.bf16.msra.mxu1 %v5361_v52  ;;  %v5456_v52 = vld [vmem:[%s7117_s3 + $0x294] ss:$8 sps:$4 sm:$0xff]  }
  0x81   :  { %3287 = vmatpush1.bf16.msra.mxu0 %v5364_v53  ;;  %762 = vmatprep.subr.bf16.mxu1 %v5369_v54  ;;  %v5459_v53 = vld [vmem:[#allocation2 + $0x294] ss:$8 sps:$4 sm:$0xff]   ;;  %v5454_v54 = vld [vmem:[%s7117_s3 + $0x290] ss:$8 sps:$4 sm:$0xff]  }
  0x82   :  { %3288 = vmatprep.subr.bf16.mxu0 %v5372_v55  ;;  %v5457_v55 = vld [vmem:[#allocation2 + $0x290] ss:$8 sps:$4 sm:$0xff]  }
  0x84   :  { %763 = vmatpush1.bf16.msra.mxu1 %v5367_v56  ;;  %v5462_v56 = vld [vmem:[%s7117_s3 + $0x2a4] ss:$8 sps:$4 sm:$0xff]  }
  0x85   :  { %3289 = vmatpush1.bf16.msra.mxu0 %v5370_v57  ;;  %764 = vmatprep.subr.bf16.mxu1 %v5375_v58  ;;  %v5465_v57 = vld [vmem:[#allocation2 + $0x2a4] ss:$8 sps:$4 sm:$0xff]   ;;  %v5460_v58 = vld [vmem:[%s7117_s3 + $0x2a0] ss:$8 sps:$4 sm:$0xff]  }
  0x86   :  { %3290 = vmatprep.subr.bf16.mxu0 %v5378_v59  ;;  %v5463_v59 = vld [vmem:[#allocation2 + $0x2a0] ss:$8 sps:$4 sm:$0xff]  }
  0x88   :  { %765 = vmatpush1.bf16.msra.mxu1 %v5373_v60  ;;  %v5468_v60 = vld [vmem:[%s7117_s3 + $0x2b4] ss:$8 sps:$4 sm:$0xff]  }
  0x89   :  { %3291 = vmatpush1.bf16.msra.mxu0 %v5376_v61  ;;  %766 = vmatprep.subr.bf16.mxu1 %v5381_v62  ;;  %v5471_v61 = vld [vmem:[#allocation2 + $0x2b4] ss:$8 sps:$4 sm:$0xff]   ;;  %v5466_v62 = vld [vmem:[%s7117_s3 + $0x2b0] ss:$8 sps:$4 sm:$0xff]  }
  0x8a   :  { %3292 = vmatprep.subr.bf16.mxu0 %v5384_v63  ;;  %v5469_v63 = vld [vmem:[#allocation2 + $0x2b0] ss:$8 sps:$4 sm:$0xff]  }
  0x8c   :  { %767 = vmatpush1.bf16.msra.mxu1 %v5379_v0  ;;  %v5474_v0 = vld [vmem:[%s7117_s3 + $0x2c4] ss:$8 sps:$4 sm:$0xff]  }
  0x8d   :  { %3293 = vmatpush1.bf16.msra.mxu0 %v5382_v1  ;;  %768 = vmatprep.subr.bf16.mxu1 %v5387_v2  ;;  %v5477_v1 = vld [vmem:[#allocation2 + $0x2c4] ss:$8 sps:$4 sm:$0xff]   ;;  %v5472_v2 = vld [vmem:[%s7117_s3 + $0x2c0] ss:$8 sps:$4 sm:$0xff]  }
  0x8e   :  { %3294 = vmatprep.subr.bf16.mxu0 %v5390_v3  ;;  %v5475_v3 = vld [vmem:[#allocation2 + $0x2c0] ss:$8 sps:$4 sm:$0xff]  }
  0x90   :  { %769 = vmatpush1.bf16.msra.mxu1 %v5385_v4  ;;  %v5480_v4 = vld [vmem:[%s7117_s3 + $0x2d4] ss:$8 sps:$4 sm:$0xff]  }
  0x91   :  { %3295 = vmatpush1.bf16.msra.mxu0 %v5388_v5  ;;  %770 = vmatprep.subr.bf16.mxu1 %v5393_v6  ;;  %v5483_v5 = vld [vmem:[#allocation2 + $0x2d4] ss:$8 sps:$4 sm:$0xff]   ;;  %v5478_v6 = vld [vmem:[%s7117_s3 + $0x2d0] ss:$8 sps:$4 sm:$0xff]  }
  0x92   :  { %3296 = vmatprep.subr.bf16.mxu0 %v5396_v7  ;;  %v5481_v7 = vld [vmem:[#allocation2 + $0x2d0] ss:$8 sps:$4 sm:$0xff]  }
  0x94   :  { %771 = vmatpush1.bf16.msra.mxu1 %v5391_v8  ;;  %v5486_v8 = vld [vmem:[%s7117_s3 + $0x2e4] ss:$8 sps:$4 sm:$0xff]  }
  0x95   :  { %3297 = vmatpush1.bf16.msra.mxu0 %v5394_v9  ;;  %783 = vmatprep.subr.bf16.mxu1 %v5402_v10  ;;  %v5489_v9 = vld [vmem:[#allocation2 + $0x2e4] ss:$8 sps:$4 sm:$0xff]   ;;  %v5484_v10 = vld [vmem:[%s7117_s3 + $0x2e0] ss:$8 sps:$4 sm:$0xff]  }
  0x96   :  { %3309 = vmatprep.subr.bf16.mxu0 %v5405_v11  ;;  %v5487_v11 = vld [vmem:[#allocation2 + $0x2e0] ss:$8 sps:$4 sm:$0xff]  }
  0x97   :  { %773 = vmatmul.mubr.bf16.vlgmr.msra.gmra.mrb[0].mxu1 %v5397_v12  ;;  %v5492_v12 = vld [vmem:[%s7117_s3 + $0x2f4] ss:$8 sps:$4 sm:$0xff]  }
  0x98   :  { %3299 = vmatmul.mubr.bf16.vlgmr.msra.gmra.mrb[0].mxu0 %v4688_v14  ;;  %784 = vmatpush1.bf16.msra.mxu1 %v5400_v13  ;;  %v5495_v13 = vld [vmem:[#allocation2 + $0x2f4] ss:$8 sps:$4 sm:$0xff]   ;;  %v5490_v14 = vld [vmem:[%s7117_s3 + $0x2f0] ss:$8 sps:$4 sm:$0xff]   ;;  %s5995_s3 = smov 1e-12  }
  0x99   :  { %3310 = vmatpush1.bf16.msra.mxu0 %v5403_v15  ;;  %785 = vmatprep.subr.bf16.mxu1 %v5408_v16  ;;  %v5493_v15 = vld [vmem:[#allocation2 + $0x2f0] ss:$8 sps:$4 sm:$0xff]   ;;  %v5501_v16 = vld [vmem:[%s7119_s5 + $0x4] ss:$8 sps:$4 sm:$0xff]  }
  0x9a   :  { %3311 = vmatprep.subr.bf16.mxu0 %v5411_v17  ;;  %815 = vmatprep.mubr.bf16.mxu1 %v5498_v22  ;;  %v5496_v17 = vld [vmem:[%s7139_s29 + $0x10] ss:$24 sps:$4 sm:$0xff]   ;;  %v6452_v22 = vld [vmem:[%s7140_s28 + $0x18] sm:$0xff] }
  0x9b   :  { %3341 = vmatprep.mubr.bf16.mxu0 %v4691_v27  ;;  %v5510_v27 = vld [vmem:[#allocation2 + $0x314] ss:$8 sps:$4 sm:$0xff]  }
  0x9c   :  { %786 = vmatpush1.bf16.msra.mxu1 %v5406_v18  ;;  %v5504_v18 = vld [vmem:[#allocation2 + $0x304] ss:$8 sps:$4 sm:$0xff]  }
  0x9d   :  { %3312 = vmatpush1.bf16.msra.mxu0 %v5409_v19  ;;  %787 = vmatprep.subr.bf16.mxu1 %v5414_v20  ;;  %v5499_v19 = vld [vmem:[%s7119_s5] ss:$8 sps:$4 sm:$0xff]  }
  0x9e   :  { %3313 = vmatprep.subr.bf16.mxu0 %v5417_v21  ;;  %v5502_v20 = vld [vmem:[#allocation2 + $0x300] ss:$8 sps:$4 sm:$0xff]   ;;  %v4690_v21 = vcombine.low %v6348_v23, %v6353_v24  ;;  %v5597_v23 = vld [vmem:[%s7141_s2 + $0x4] ss:$24 sps:$4 sm:$0xff]  }
  0xa0   :  { %788 = vmatpush1.bf16.msra.mxu1 %v5412_v25  ;;  %v6457_v25 = vld [vmem:[%s7140_s28 + $0x58] sm:$0xff] }
  0xa1   :  { %3314 = vmatpush1.bf16.msra.mxu0 %v5415_v26  ;;  %789 = vmatprep.subr.bf16.mxu1 %v5420_v28  ;;  %v5507_v26 = vld [vmem:[%s7119_s5 + $0x14] ss:$8 sps:$4 sm:$0xff]   ;;  %v4693_v24 = vcombine.high %v6452_v22, %v6457_v25  ;;  %v5505_v28 = vld [vmem:[%s7119_s5 + $0x10] ss:$8 sps:$4 sm:$0xff]  }
  0xa2   :  { %3315 = vmatprep.subr.bf16.mxu0 %v5423_v29  ;;  %v5508_v29 = vld [vmem:[#allocation2 + $0x310] ss:$8 sps:$4 sm:$0xff]  }
  0xa4   :  { %790 = vmatpush1.bf16.msra.mxu1 %v5418_v30  ;;  %v5513_v30 = vld [vmem:[%s7119_s5 + $0x24] ss:$8 sps:$4 sm:$0xff]  }
  0xa5   :  { %3316 = vmatpush1.bf16.msra.mxu0 %v5421_v31  ;;  %791 = vmatprep.subr.bf16.mxu1 %v5426_v32  ;;  %v5516_v31 = vld [vmem:[#allocation2 + $0x324] ss:$8 sps:$4 sm:$0xff]   ;;  %v5511_v32 = vld [vmem:[%s7119_s5 + $0x20] ss:$8 sps:$4 sm:$0xff]  }
  0xa6   :  { %3317 = vmatprep.subr.bf16.mxu0 %v5429_v33  ;;  %v5514_v33 = vld [vmem:[#allocation2 + $0x320] ss:$8 sps:$4 sm:$0xff]  }
  0xa8   :  { %792 = vmatpush1.bf16.msra.mxu1 %v5424_v34  ;;  %v5519_v34 = vld [vmem:[%s7119_s5 + $0x34] ss:$8 sps:$4 sm:$0xff]  }
  0xa9   :  { %3318 = vmatpush1.bf16.msra.mxu0 %v5427_v35  ;;  %793 = vmatprep.subr.bf16.mxu1 %v5432_v36  ;;  %v5522_v35 = vld [vmem:[#allocation2 + $0x334] ss:$8 sps:$4 sm:$0xff]   ;;  %v5517_v36 = vld [vmem:[%s7119_s5 + $0x30] ss:$8 sps:$4 sm:$0xff]  }
  0xaa   :  { %3319 = vmatprep.subr.bf16.mxu0 %v5435_v37  ;;  %v5520_v37 = vld [vmem:[#allocation2 + $0x330] ss:$8 sps:$4 sm:$0xff]  }
  0xac   :  { %794 = vmatpush1.bf16.msra.mxu1 %v5430_v38  ;;  %v5525_v38 = vld [vmem:[%s7119_s5 + $0x44] ss:$8 sps:$4 sm:$0xff]  }
  0xad   :  { %3320 = vmatpush1.bf16.msra.mxu0 %v5433_v39  ;;  %795 = vmatprep.subr.bf16.mxu1 %v5438_v40  ;;  %v5528_v39 = vld [vmem:[#allocation2 + $0x344] ss:$8 sps:$4 sm:$0xff]   ;;  %v5523_v40 = vld [vmem:[%s7119_s5 + $0x40] ss:$8 sps:$4 sm:$0xff]  }
  0xae   :  { %3321 = vmatprep.subr.bf16.mxu0 %v5441_v41  ;;  %v5526_v41 = vld [vmem:[#allocation2 + $0x340] ss:$8 sps:$4 sm:$0xff]  }
  0xb0   :  { %796 = vmatpush1.bf16.msra.mxu1 %v5436_v42  ;;  %v5531_v42 = vld [vmem:[%s7119_s5 + $0x54] ss:$8 sps:$4 sm:$0xff]  }
  0xb1   :  { %3322 = vmatpush1.bf16.msra.mxu0 %v5439_v43  ;;  %797 = vmatprep.subr.bf16.mxu1 %v5444_v44  ;;  %v5534_v43 = vld [vmem:[#allocation2 + $0x354] ss:$8 sps:$4 sm:$0xff]   ;;  %v5529_v44 = vld [vmem:[%s7119_s5 + $0x50] ss:$8 sps:$4 sm:$0xff]  }
  0xb2   :  { %3323 = vmatprep.subr.bf16.mxu0 %v5447_v45  ;;  %v5532_v45 = vld [vmem:[#allocation2 + $0x350] ss:$8 sps:$4 sm:$0xff]  }
  0xb4   :  { %798 = vmatpush1.bf16.msra.mxu1 %v5442_v46  ;;  %v5537_v46 = vld [vmem:[%s7119_s5 + $0x64] ss:$8 sps:$4 sm:$0xff]  }
  0xb5   :  { %3324 = vmatpush1.bf16.msra.mxu0 %v5445_v47  ;;  %799 = vmatprep.subr.bf16.mxu1 %v5450_v48  ;;  %v5540_v47 = vld [vmem:[#allocation2 + $0x364] ss:$8 sps:$4 sm:$0xff]   ;;  %v5535_v48 = vld [vmem:[%s7119_s5 + $0x60] ss:$8 sps:$4 sm:$0xff]  }
  0xb6   :  { %3325 = vmatprep.subr.bf16.mxu0 %v5453_v49  ;;  %v5538_v49 = vld [vmem:[#allocation2 + $0x360] ss:$8 sps:$4 sm:$0xff]  }
  0xb8   :  { %800 = vmatpush1.bf16.msra.mxu1 %v5448_v50  ;;  %v5543_v50 = vld [vmem:[%s7119_s5 + $0x74] ss:$8 sps:$4 sm:$0xff]  }
  0xb9   :  { %3326 = vmatpush1.bf16.msra.mxu0 %v5451_v51  ;;  %801 = vmatprep.subr.bf16.mxu1 %v5456_v52  ;;  %v5546_v51 = vld [vmem:[#allocation2 + $0x374] ss:$8 sps:$4 sm:$0xff]   ;;  %v5541_v52 = vld [vmem:[%s7119_s5 + $0x70] ss:$8 sps:$4 sm:$0xff]  }
  0xba   :  { %3327 = vmatprep.subr.bf16.mxu0 %v5459_v53  ;;  %v5544_v53 = vld [vmem:[#allocation2 + $0x370] ss:$8 sps:$4 sm:$0xff]  }
  0xbc   :  { %802 = vmatpush1.bf16.msra.mxu1 %v5454_v54  ;;  %v5549_v54 = vld [vmem:[%s7119_s5 + $0x84] ss:$8 sps:$4 sm:$0xff]  }
  0xbd   :  { %3328 = vmatpush1.bf16.msra.mxu0 %v5457_v55  ;;  %803 = vmatprep.subr.bf16.mxu1 %v5462_v56  ;;  %v5552_v55 = vld [vmem:[#allocation2 + $0x384] ss:$8 sps:$4 sm:$0xff]   ;;  %v5547_v56 = vld [vmem:[%s7119_s5 + $0x80] ss:$8 sps:$4 sm:$0xff]  }
  0xbe   :  { %3329 = vmatprep.subr.bf16.mxu0 %v5465_v57  ;;  %v5550_v57 = vld [vmem:[#allocation2 + $0x380] ss:$8 sps:$4 sm:$0xff]  }
  0xc0   :  { %804 = vmatpush1.bf16.msra.mxu1 %v5460_v58  ;;  %v5555_v58 = vld [vmem:[%s7119_s5 + $0x94] ss:$8 sps:$4 sm:$0xff]  }
  0xc1   :  { %3330 = vmatpush1.bf16.msra.mxu0 %v5463_v59  ;;  %805 = vmatprep.subr.bf16.mxu1 %v5468_v60  ;;  %v5558_v59 = vld [vmem:[#allocation2 + $0x394] ss:$8 sps:$4 sm:$0xff]   ;;  %v5553_v60 = vld [vmem:[%s7119_s5 + $0x90] ss:$8 sps:$4 sm:$0xff]  }
  0xc2   :  { %3331 = vmatprep.subr.bf16.mxu0 %v5471_v61  ;;  %v5556_v61 = vld [vmem:[#allocation2 + $0x390] ss:$8 sps:$4 sm:$0xff]  }
  0xc4   :  { %806 = vmatpush1.bf16.msra.mxu1 %v5466_v62  ;;  %v5561_v62 = vld [vmem:[%s7119_s5 + $0xa4] ss:$8 sps:$4 sm:$0xff]  }
  0xc5   :  { %3332 = vmatpush1.bf16.msra.mxu0 %v5469_v63  ;;  %807 = vmatprep.subr.bf16.mxu1 %v5474_v0  ;;  %v5564_v63 = vld [vmem:[#allocation2 + $0x3a4] ss:$8 sps:$4 sm:$0xff]   ;;  %v5559_v0 = vld [vmem:[%s7119_s5 + $0xa0] ss:$8 sps:$4 sm:$0xff]  }
  0xc6   :  { %3333 = vmatprep.subr.bf16.mxu0 %v5477_v1  ;;  %v5562_v1 = vld [vmem:[#allocation2 + $0x3a0] ss:$8 sps:$4 sm:$0xff]  }
  0xc8   :  { %808 = vmatpush1.bf16.msra.mxu1 %v5472_v2  ;;  %v5567_v2 = vld [vmem:[%s7119_s5 + $0xb4] ss:$8 sps:$4 sm:$0xff]  }
  0xc9   :  { %3334 = vmatpush1.bf16.msra.mxu0 %v5475_v3  ;;  %809 = vmatprep.subr.bf16.mxu1 %v5480_v4  ;;  %v5570_v3 = vld [vmem:[#allocation2 + $0x3b4] ss:$8 sps:$4 sm:$0xff]   ;;  %v5565_v4 = vld [vmem:[%s7119_s5 + $0xb0] ss:$8 sps:$4 sm:$0xff]  }
  0xca   :  { %3335 = vmatprep.subr.bf16.mxu0 %v5483_v5  ;;  %v5568_v5 = vld [vmem:[#allocation2 + $0x3b0] ss:$8 sps:$4 sm:$0xff]  }
  0xcc   :  { %810 = vmatpush1.bf16.msra.mxu1 %v5478_v6  ;;  %v5573_v6 = vld [vmem:[%s7119_s5 + $0xc4] ss:$8 sps:$4 sm:$0xff]  }
  0xcd   :  { %3336 = vmatpush1.bf16.msra.mxu0 %v5481_v7  ;;  %811 = vmatprep.subr.bf16.mxu1 %v5486_v8  ;;  %v5576_v7 = vld [vmem:[#allocation2 + $0x3c4] ss:$8 sps:$4 sm:$0xff]   ;;  %v5571_v8 = vld [vmem:[%s7119_s5 + $0xc0] ss:$8 sps:$4 sm:$0xff]  }
  0xce   :  { %3337 = vmatprep.subr.bf16.mxu0 %v5489_v9  ;;  %v5574_v9 = vld [vmem:[#allocation2 + $0x3c0] ss:$8 sps:$4 sm:$0xff]  }
  0xd0   :  { %812 = vmatpush1.bf16.msra.mxu1 %v5484_v10  ;;  %v5579_v10 = vld [vmem:[%s7119_s5 + $0xd4] ss:$8 sps:$4 sm:$0xff]  }
  0xd1   :  { %3338 = vmatpush1.bf16.msra.mxu0 %v5487_v11  ;;  %813 = vmatprep.subr.bf16.mxu1 %v5492_v12  ;;  %v5582_v11 = vld [vmem:[#allocation2 + $0x3d4] ss:$8 sps:$4 sm:$0xff]   ;;  %v5577_v12 = vld [vmem:[%s7119_s5 + $0xd0] ss:$8 sps:$4 sm:$0xff]  }
  0xd2   :  { %3339 = vmatprep.subr.bf16.mxu0 %v5495_v13  ;;  %v5580_v13 = vld [vmem:[#allocation2 + $0x3d0] ss:$8 sps:$4 sm:$0xff]  }
  0xd4   :  { %814 = vmatpush1.bf16.msra.mxu1 %v5490_v14  ;;  %v5585_v14 = vld [vmem:[%s7119_s5 + $0xe4] ss:$8 sps:$4 sm:$0xff]  }
  0xd5   :  { %3340 = vmatpush1.bf16.msra.mxu0 %v5493_v15  ;;  %1450 = vmatprep.subr.bf16.mxu1 %v5501_v16  ;;  %v5588_v15 = vld [vmem:[#allocation2 + $0x3e4] ss:$8 sps:$4 sm:$0xff]   ;;  %v5583_v16 = vld [vmem:[%s7119_s5 + $0xe0] ss:$8 sps:$4 sm:$0xff]  }
  0xd6   :  { %3352 = vmatprep.subr.bf16.mxu0 %v5504_v18  ;;  %v5591_v18 = vld [vmem:[%s7119_s5 + $0xf4] ss:$8 sps:$4 sm:$0xff]  }
  0xd7   :  { %816 = vmatmul.mubr.bf16.vlgmr.msra.gmra.mrb[0].mxu1 %v5496_v17  ;;  %v5586_v17 = vld [vmem:[#allocation2 + $0x3e0] ss:$8 sps:$4 sm:$0xff]  }
  0xd8   :  { %3342 = vmatmul.mubr.bf16.vlgmr.msra.gmra.mrb[0].mxu0 %v4690_v21  ;;  %1451 = vmatpush1.bf16.msra.mxu1 %v5499_v19  ;;  %v5594_v19 = vld [vmem:[#allocation2 + $0x3f4] ss:$8 sps:$4 sm:$0xff]   ;;  %v5592_v21 = vld [vmem:[#allocation2 + $0x3f0] ss:$8 sps:$4 sm:$0xff]  }
  0xd9   :  { %3353 = vmatpush1.bf16.msra.mxu0 %v5502_v20  ;;  %1452 = vmatprep.subr.bf16.mxu1 %v5507_v26  ;;  %v5589_v20 = vld [vmem:[%s7119_s5 + $0xf0] ss:$8 sps:$4 sm:$0xff]  }
  0xda   :  { %3354 = vmatprep.subr.bf16.mxu0 %v5510_v27  ;;  %1482 = vmatprep.mubr.bf16.mxu1 %v5597_v23  ;;  %v5595_v26 = vld [vmem:[%s7141_s2] ss:$24 sps:$4 sm:$0xff]   ;;  %v5600_v27 = vld [vmem:[%s7119_s5 + $0x104] ss:$8 sps:$4 sm:$0xff]  }
  0xdb   :  { %3384 = vmatprep.mubr.bf16.mxu0 %v4693_v24  ;;  %v5603_v23 = vld [vmem:[#allocation2 + $0x404] ss:$8 sps:$4 sm:$0xff]   ;;  %v6563_v24 = vld [vmem:[%s7140_s28 + $0x20] sm:$0xff] }
  0xdc   :  { %1453 = vmatpush1.bf16.msra.mxu1 %v5505_v28  ;;  %v4692_v28 = vcombine.low %v6452_v22, %v6457_v25  ;;  %v5696_v22 = vld [vmem:[%s7141_s2 + $0xc] ss:$24 sps:$4 sm:$0xff]  }
  0xdd   :  { %3355 = vmatpush1.bf16.msra.mxu0 %v5508_v29  ;;  %1454 = vmatprep.subr.bf16.mxu1 %v5513_v30  ;;  %v6570_v29 = vld [vmem:[%s7140_s28 + $0x60] sm:$0xff] }
  0xde   :  { %3356 = vmatprep.subr.bf16.mxu0 %v5516_v31  ;;  %v5598_v30 = vld [vmem:[%s7119_s5 + $0x100] ss:$8 sps:$4 sm:$0xff]   ;;  %v4695_v25 = vcombine.high %v6563_v24, %v6570_v29 }
  0xdf   :  { %v5601_v31 = vld [vmem:[#allocation2 + $0x400] ss:$8 sps:$4 sm:$0xff]  }
  0xe0   :  { %1455 = vmatpush1.bf16.msra.mxu1 %v5511_v32  ;;  %v5606_v32 = vld [vmem:[%s7119_s5 + $0x114] ss:$8 sps:$4 sm:$0xff]  }
  0xe1   :  { %3357 = vmatpush1.bf16.msra.mxu0 %v5514_v33  ;;  %1456 = vmatprep.subr.bf16.mxu1 %v5519_v34  ;;  %v5609_v33 = vld [vmem:[#allocation2 + $0x414] ss:$8 sps:$4 sm:$0xff]   ;;  %v5604_v34 = vld [vmem:[%s7119_s5 + $0x110] ss:$8 sps:$4 sm:$0xff]  }
  0xe2   :  { %3358 = vmatprep.subr.bf16.mxu0 %v5522_v35  ;;  %v5607_v35 = vld [vmem:[#allocation2 + $0x410] ss:$8 sps:$4 sm:$0xff]  }
  0xe4   :  { %1457 = vmatpush1.bf16.msra.mxu1 %v5517_v36  ;;  %v5612_v36 = vld [vmem:[%s7119_s5 + $0x124] ss:$8 sps:$4 sm:$0xff]  }
  0xe5   :  { %3359 = vmatpush1.bf16.msra.mxu0 %v5520_v37  ;;  %1458 = vmatprep.subr.bf16.mxu1 %v5525_v38  ;;  %v5615_v37 = vld [vmem:[#allocation2 + $0x424] ss:$8 sps:$4 sm:$0xff]   ;;  %v5610_v38 = vld [vmem:[%s7119_s5 + $0x120] ss:$8 sps:$4 sm:$0xff]  }
  0xe6   :  { %3360 = vmatprep.subr.bf16.mxu0 %v5528_v39  ;;  %v5613_v39 = vld [vmem:[#allocation2 + $0x420] ss:$8 sps:$4 sm:$0xff]  }
  0xe8   :  { %1459 = vmatpush1.bf16.msra.mxu1 %v5523_v40  ;;  %v5618_v40 = vld [vmem:[%s7119_s5 + $0x134] ss:$8 sps:$4 sm:$0xff]  }
  0xe9   :  { %3361 = vmatpush1.bf16.msra.mxu0 %v5526_v41  ;;  %1460 = vmatprep.subr.bf16.mxu1 %v5531_v42  ;;  %v5621_v41 = vld [vmem:[#allocation2 + $0x434] ss:$8 sps:$4 sm:$0xff]   ;;  %v5616_v42 = vld [vmem:[%s7119_s5 + $0x130] ss:$8 sps:$4 sm:$0xff]  }
  0xea   :  { %3362 = vmatprep.subr.bf16.mxu0 %v5534_v43  ;;  %v5619_v43 = vld [vmem:[#allocation2 + $0x430] ss:$8 sps:$4 sm:$0xff]  }
  0xec   :  { %1461 = vmatpush1.bf16.msra.mxu1 %v5529_v44  ;;  %v5624_v44 = vld [vmem:[%s7119_s5 + $0x144] ss:$8 sps:$4 sm:$0xff]  }
  0xed   :  { %3363 = vmatpush1.bf16.msra.mxu0 %v5532_v45  ;;  %1462 = vmatprep.subr.bf16.mxu1 %v5537_v46  ;;  %v5627_v45 = vld [vmem:[#allocation2 + $0x444] ss:$8 sps:$4 sm:$0xff]   ;;  %v5622_v46 = vld [vmem:[%s7119_s5 + $0x140] ss:$8 sps:$4 sm:$0xff]  }
  0xee   :  { %3364 = vmatprep.subr.bf16.mxu0 %v5540_v47  ;;  %v5625_v47 = vld [vmem:[#allocation2 + $0x440] ss:$8 sps:$4 sm:$0xff]  }
  0xf0   :  { %1463 = vmatpush1.bf16.msra.mxu1 %v5535_v48  ;;  %v5630_v48 = vld [vmem:[%s7119_s5 + $0x154] ss:$8 sps:$4 sm:$0xff]  }
  0xf1   :  { %3365 = vmatpush1.bf16.msra.mxu0 %v5538_v49  ;;  %1464 = vmatprep.subr.bf16.mxu1 %v5543_v50  ;;  %v5633_v49 = vld [vmem:[#allocation2 + $0x454] ss:$8 sps:$4 sm:$0xff]   ;;  %v5628_v50 = vld [vmem:[%s7119_s5 + $0x150] ss:$8 sps:$4 sm:$0xff]  }
  0xf2   :  { %3366 = vmatprep.subr.bf16.mxu0 %v5546_v51  ;;  %v5631_v51 = vld [vmem:[#allocation2 + $0x450] ss:$8 sps:$4 sm:$0xff]  }
  0xf4   :  { %1465 = vmatpush1.bf16.msra.mxu1 %v5541_v52  ;;  %v5636_v52 = vld [vmem:[%s7119_s5 + $0x164] ss:$8 sps:$4 sm:$0xff]  }
  0xf5   :  { %3367 = vmatpush1.bf16.msra.mxu0 %v5544_v53  ;;  %1466 = vmatprep.subr.bf16.mxu1 %v5549_v54  ;;  %v5639_v53 = vld [vmem:[#allocation2 + $0x464] ss:$8 sps:$4 sm:$0xff]   ;;  %v5634_v54 = vld [vmem:[%s7119_s5 + $0x160] ss:$8 sps:$4 sm:$0xff]  }
  0xf6   :  { %3368 = vmatprep.subr.bf16.mxu0 %v5552_v55  ;;  %v5637_v55 = vld [vmem:[#allocation2 + $0x460] ss:$8 sps:$4 sm:$0xff]  }
  0xf8   :  { %1467 = vmatpush1.bf16.msra.mxu1 %v5547_v56  ;;  %v5642_v56 = vld [vmem:[%s7119_s5 + $0x174] ss:$8 sps:$4 sm:$0xff]  }
  0xf9   :  { %3369 = vmatpush1.bf16.msra.mxu0 %v5550_v57  ;;  %1468 = vmatprep.subr.bf16.mxu1 %v5555_v58  ;;  %v5645_v57 = vld [vmem:[#allocation2 + $0x474] ss:$8 sps:$4 sm:$0xff]   ;;  %v5640_v58 = vld [vmem:[%s7119_s5 + $0x170] ss:$8 sps:$4 sm:$0xff]  }
  0xfa   :  { %3370 = vmatprep.subr.bf16.mxu0 %v5558_v59  ;;  %v5643_v59 = vld [vmem:[#allocation2 + $0x470] ss:$8 sps:$4 sm:$0xff]  }
  0xfc   :  { %1469 = vmatpush1.bf16.msra.mxu1 %v5553_v60  ;;  %v5648_v60 = vld [vmem:[%s7119_s5 + $0x184] ss:$8 sps:$4 sm:$0xff]  }
  0xfd   :  { %3371 = vmatpush1.bf16.msra.mxu0 %v5556_v61  ;;  %1470 = vmatprep.subr.bf16.mxu1 %v5561_v62  ;;  %v5651_v61 = vld [vmem:[#allocation2 + $0x484] ss:$8 sps:$4 sm:$0xff]   ;;  %v5646_v62 = vld [vmem:[%s7119_s5 + $0x180] ss:$8 sps:$4 sm:$0xff]  }
  0xfe   :  { %3372 = vmatprep.subr.bf16.mxu0 %v5564_v63  ;;  %v5649_v63 = vld [vmem:[#allocation2 + $0x480] ss:$8 sps:$4 sm:$0xff]  }
 0x100   :  { %1471 = vmatpush1.bf16.msra.mxu1 %v5559_v0  ;;  %v5654_v0 = vld [vmem:[%s7119_s5 + $0x194] ss:$8 sps:$4 sm:$0xff]  }
 0x101   :  { %3373 = vmatpush1.bf16.msra.mxu0 %v5562_v1  ;;  %1472 = vmatprep.subr.bf16.mxu1 %v5567_v2  ;;  %v5657_v1 = vld [vmem:[#allocation2 + $0x494] ss:$8 sps:$4 sm:$0xff]   ;;  %v5652_v2 = vld [vmem:[%s7119_s5 + $0x190] ss:$8 sps:$4 sm:$0xff]  }
 0x102   :  { %3374 = vmatprep.subr.bf16.mxu0 %v5570_v3  ;;  %v5655_v3 = vld [vmem:[#allocation2 + $0x490] ss:$8 sps:$4 sm:$0xff]  }
 0x104   :  { %1473 = vmatpush1.bf16.msra.mxu1 %v5565_v4  ;;  %v5660_v4 = vld [vmem:[%s7119_s5 + $0x1a4] ss:$8 sps:$4 sm:$0xff]  }
 0x105   :  { %3375 = vmatpush1.bf16.msra.mxu0 %v5568_v5  ;;  %1474 = vmatprep.subr.bf16.mxu1 %v5573_v6  ;;  %v5663_v5 = vld [vmem:[#allocation2 + $0x4a4] ss:$8 sps:$4 sm:$0xff]   ;;  %v5658_v6 = vld [vmem:[%s7119_s5 + $0x1a0] ss:$8 sps:$4 sm:$0xff]  }
 0x106   :  { %3376 = vmatprep.subr.bf16.mxu0 %v5576_v7  ;;  %v5661_v7 = vld [vmem:[#allocation2 + $0x4a0] ss:$8 sps:$4 sm:$0xff]  }
 0x108   :  { %1475 = vmatpush1.bf16.msra.mxu1 %v5571_v8  ;;  %v5666_v8 = vld [vmem:[%s7119_s5 + $0x1b4] ss:$8 sps:$4 sm:$0xff]  }
 0x109   :  { %3377 = vmatpush1.bf16.msra.mxu0 %v5574_v9  ;;  %1476 = vmatprep.subr.bf16.mxu1 %v5579_v10  ;;  %v5669_v9 = vld [vmem:[#allocation2 + $0x4b4] ss:$8 sps:$4 sm:$0xff]   ;;  %v5664_v10 = vld [vmem:[%s7119_s5 + $0x1b0] ss:$8 sps:$4 sm:$0xff]  }
 0x10a   :  { %3378 = vmatprep.subr.bf16.mxu0 %v5582_v11  ;;  %v5667_v11 = vld [vmem:[#allocation2 + $0x4b0] ss:$8 sps:$4 sm:$0xff]  }
 0x10c   :  { %1477 = vmatpush1.bf16.msra.mxu1 %v5577_v12  ;;  %v5672_v12 = vld [vmem:[%s7119_s5 + $0x1c4] ss:$8 sps:$4 sm:$0xff]  }
 0x10d   :  { %3379 = vmatpush1.bf16.msra.mxu0 %v5580_v13  ;;  %1478 = vmatprep.subr.bf16.mxu1 %v5585_v14  ;;  %v5675_v13 = vld [vmem:[#allocation2 + $0x4c4] ss:$8 sps:$4 sm:$0xff]   ;;  %v5670_v14 = vld [vmem:[%s7119_s5 + $0x1c0] ss:$8 sps:$4 sm:$0xff]  }
 0x10e   :  { %3380 = vmatprep.subr.bf16.mxu0 %v5588_v15  ;;  %v5673_v15 = vld [vmem:[#allocation2 + $0x4c0] ss:$8 sps:$4 sm:$0xff]  }
 0x110   :  { %1479 = vmatpush1.bf16.msra.mxu1 %v5583_v16  ;;  %v5678_v16 = vld [vmem:[%s7119_s5 + $0x1d4] ss:$8 sps:$4 sm:$0xff]  }
 0x111   :  { %3381 = vmatpush1.bf16.msra.mxu0 %v5586_v17  ;;  %1480 = vmatprep.subr.bf16.mxu1 %v5591_v18  ;;  %v5681_v17 = vld [vmem:[#allocation2 + $0x4d4] ss:$8 sps:$4 sm:$0xff]   ;;  %v5676_v18 = vld [vmem:[%s7119_s5 + $0x1d0] ss:$8 sps:$4 sm:$0xff]  }
 0x112   :  { %3382 = vmatprep.subr.bf16.mxu0 %v5594_v19  ;;  %v5679_v19 = vld [vmem:[#allocation2 + $0x4d0] ss:$8 sps:$4 sm:$0xff]  }
 0x114   :  { %1481 = vmatpush1.bf16.msra.mxu1 %v5589_v20  ;;  %v5684_v20 = vld [vmem:[%s7119_s5 + $0x1e4] ss:$8 sps:$4 sm:$0xff]  }
 0x115   :  { %3383 = vmatpush1.bf16.msra.mxu0 %v5592_v21  ;;  %1493 = vmatprep.subr.bf16.mxu1 %v5600_v27  ;;  %v5687_v21 = vld [vmem:[#allocation2 + $0x4e4] ss:$8 sps:$4 sm:$0xff]   ;;  %v5685_v27 = vld [vmem:[#allocation2 + $0x4e0] ss:$8 sps:$4 sm:$0xff]  }
 0x116   :  { %3395 = vmatprep.subr.bf16.mxu0 %v5603_v23  ;;  %v5690_v23 = vld [vmem:[%s7119_s5 + $0x1f4] ss:$8 sps:$4 sm:$0xff]  }
 0x117   :  { %1483 = vmatmul.mubr.bf16.vlgmr.msra.gmra.mrb[4].mxu1 %v5595_v26  ;;  %v5682_v26 = vld [vmem:[%s7119_s5 + $0x1e0] ss:$8 sps:$4 sm:$0xff]  }
 0x118   :  { %3385 = vmatmul.mubr.bf16.vlgmr.msra.gmra.mrb[0].mxu0 %v4692_v28  ;;  %1494 = vmatpush1.bf16.msra.mxu1 %v5598_v30  ;;  %v5693_v28 = vld [vmem:[#allocation2 + $0x4f4] ss:$8 sps:$4 sm:$0xff]   ;;  %v5688_v30 = vld [vmem:[%s7119_s5 + $0x1f0] ss:$8 sps:$4 sm:$0xff]  }
 0x119   :  { %3396 = vmatpush1.bf16.msra.mxu0 %v5601_v31  ;;  %1495 = vmatprep.subr.bf16.mxu1 %v5606_v32  ;;  %v5691_v31 = vld [vmem:[#allocation2 + $0x4f0] ss:$8 sps:$4 sm:$0xff]   ;;  %v5699_v32 = vld [vmem:[%s7119_s5 + $0x204] ss:$8 sps:$4 sm:$0xff]  }
 0x11a   :  { %3397 = vmatprep.subr.bf16.mxu0 %v5609_v33  ;;  %1525 = vmatprep.mubr.bf16.mxu1 %v5696_v22  ;;  %v5702_v33 = vld [vmem:[#allocation2 + $0x504] ss:$8 sps:$4 sm:$0xff]   ;;  %v5694_v22 = vld [vmem:[%s7141_s2 + $0x8] ss:$24 sps:$4 sm:$0xff]  }
 0x11b   :  { %3427 = vmatprep.mubr.bf16.mxu0 %v4695_v25  ;;  %v6679_v25 = vld [vmem:[%s7140_s28 + $0x28] sm:$0xff] }
 0x11c   :  { %1496 = vmatpush1.bf16.msra.mxu1 %v5604_v34  ;;  %v6684_v34 = vld [vmem:[%s7140_s28 + $0x68] sm:$0xff] }
 0x11d   :  { %3398 = vmatpush1.bf16.msra.mxu0 %v5607_v35  ;;  %1497 = vmatprep.subr.bf16.mxu1 %v5612_v36  ;;  %v5697_v35 = vld [vmem:[%s7119_s5 + $0x200] ss:$8 sps:$4 sm:$0xff]   ;;  %v4694_v36 = vcombine.low %v6563_v24, %v6570_v29  ;;  %v4697_v24 = vcombine.high %v6679_v25, %v6684_v34  ;;  %v5711_v29 = vld [vmem:[%s7119_s5 + $0x224] ss:$8 sps:$4 sm:$0xff]  }
 0x11e   :  { %3399 = vmatprep.subr.bf16.mxu0 %v5615_v37  ;;  %v5700_v37 = vld [vmem:[#allocation2 + $0x500] ss:$8 sps:$4 sm:$0xff]  }
 0x120   :  { %1498 = vmatpush1.bf16.msra.mxu1 %v5610_v38  ;;  %v5705_v38 = vld [vmem:[%s7119_s5 + $0x214] ss:$8 sps:$4 sm:$0xff]  }
 0x121   :  { %3400 = vmatpush1.bf16.msra.mxu0 %v5613_v39  ;;  %1499 = vmatprep.subr.bf16.mxu1 %v5618_v40  ;;  %v5708_v39 = vld [vmem:[#allocation2 + $0x514] ss:$8 sps:$4 sm:$0xff]   ;;  %v5795_v40 = vld [vmem:[%s7141_s2 + $0x14] ss:$24 sps:$4 sm:$0xff]  }
 0x122   :  { %3401 = vmatprep.subr.bf16.mxu0 %v5621_v41  ;;  %v5703_v41 = vld [vmem:[%s7119_s5 + $0x210] ss:$8 sps:$4 sm:$0xff]  }
 0x124   :  { %1500 = vmatpush1.bf16.msra.mxu1 %v5616_v42  ;;  %v5706_v42 = vld [vmem:[#allocation2 + $0x510] ss:$8 sps:$4 sm:$0xff]  }
 0x125   :  { %3402 = vmatpush1.bf16.msra.mxu0 %v5619_v43  ;;  %1501 = vmatprep.subr.bf16.mxu1 %v5624_v44  ;;  %v5714_v43 = vld [vmem:[#allocation2 + $0x524] ss:$8 sps:$4 sm:$0xff]   ;;  %v5709_v44 = vld [vmem:[%s7119_s5 + $0x220] ss:$8 sps:$4 sm:$0xff]  }
 0x126   :  { %3403 = vmatprep.subr.bf16.mxu0 %v5627_v45  ;;  %v5712_v45 = vld [vmem:[#allocation2 + $0x520] ss:$8 sps:$4 sm:$0xff]  }
 0x128   :  { %1502 = vmatpush1.bf16.msra.mxu1 %v5622_v46  ;;  %v5717_v46 = vld [vmem:[%s7119_s5 + $0x234] ss:$8 sps:$4 sm:$0xff]  }
 0x129   :  { %3404 = vmatpush1.bf16.msra.mxu0 %v5625_v47  ;;  %1503 = vmatprep.subr.bf16.mxu1 %v5630_v48  ;;  %v5720_v47 = vld [vmem:[#allocation2 + $0x534] ss:$8 sps:$4 sm:$0xff]   ;;  %v5715_v48 = vld [vmem:[%s7119_s5 + $0x230] ss:$8 sps:$4 sm:$0xff]  }
 0x12a   :  { %3405 = vmatprep.subr.bf16.mxu0 %v5633_v49  ;;  %v5718_v49 = vld [vmem:[#allocation2 + $0x530] ss:$8 sps:$4 sm:$0xff]  }
 0x12c   :  { %1504 = vmatpush1.bf16.msra.mxu1 %v5628_v50  ;;  %v5723_v50 = vld [vmem:[%s7119_s5 + $0x244] ss:$8 sps:$4 sm:$0xff]  }
 0x12d   :  { %3406 = vmatpush1.bf16.msra.mxu0 %v5631_v51  ;;  %1505 = vmatprep.subr.bf16.mxu1 %v5636_v52  ;;  %v5726_v51 = vld [vmem:[#allocation2 + $0x544] ss:$8 sps:$4 sm:$0xff]   ;;  %v5721_v52 = vld [vmem:[%s7119_s5 + $0x240] ss:$8 sps:$4 sm:$0xff]  }
 0x12e   :  { %3407 = vmatprep.subr.bf16.mxu0 %v5639_v53  ;;  %v5724_v53 = vld [vmem:[#allocation2 + $0x540] ss:$8 sps:$4 sm:$0xff]  }
 0x130   :  { %1506 = vmatpush1.bf16.msra.mxu1 %v5634_v54  ;;  %v5729_v54 = vld [vmem:[%s7119_s5 + $0x254] ss:$8 sps:$4 sm:$0xff]  }
 0x131   :  { %3408 = vmatpush1.bf16.msra.mxu0 %v5637_v55  ;;  %1507 = vmatprep.subr.bf16.mxu1 %v5642_v56  ;;  %v5732_v55 = vld [vmem:[#allocation2 + $0x554] ss:$8 sps:$4 sm:$0xff]   ;;  %v5727_v56 = vld [vmem:[%s7119_s5 + $0x250] ss:$8 sps:$4 sm:$0xff]  }
 0x132   :  { %3409 = vmatprep.subr.bf16.mxu0 %v5645_v57  ;;  %v5730_v57 = vld [vmem:[#allocation2 + $0x550] ss:$8 sps:$4 sm:$0xff]  }
 0x134   :  { %1508 = vmatpush1.bf16.msra.mxu1 %v5640_v58  ;;  %v5735_v58 = vld [vmem:[%s7119_s5 + $0x264] ss:$8 sps:$4 sm:$0xff]  }
 0x135   :  { %3410 = vmatpush1.bf16.msra.mxu0 %v5643_v59  ;;  %1509 = vmatprep.subr.bf16.mxu1 %v5648_v60  ;;  %v5738_v59 = vld [vmem:[#allocation2 + $0x564] ss:$8 sps:$4 sm:$0xff]   ;;  %v5733_v60 = vld [vmem:[%s7119_s5 + $0x260] ss:$8 sps:$4 sm:$0xff]  }
 0x136   :  { %3411 = vmatprep.subr.bf16.mxu0 %v5651_v61  ;;  %v5736_v61 = vld [vmem:[#allocation2 + $0x560] ss:$8 sps:$4 sm:$0xff]  }
 0x138   :  { %1510 = vmatpush1.bf16.msra.mxu1 %v5646_v62  ;;  %v5741_v62 = vld [vmem:[%s7119_s5 + $0x274] ss:$8 sps:$4 sm:$0xff]  }
 0x139   :  { %3412 = vmatpush1.bf16.msra.mxu0 %v5649_v63  ;;  %1511 = vmatprep.subr.bf16.mxu1 %v5654_v0  ;;  %v5744_v63 = vld [vmem:[#allocation2 + $0x574] ss:$8 sps:$4 sm:$0xff]   ;;  %v5739_v0 = vld [vmem:[%s7119_s5 + $0x270] ss:$8 sps:$4 sm:$0xff]  }
 0x13a   :  { %3413 = vmatprep.subr.bf16.mxu0 %v5657_v1  ;;  %v5742_v1 = vld [vmem:[#allocation2 + $0x570] ss:$8 sps:$4 sm:$0xff]  }
 0x13c   :  { %1512 = vmatpush1.bf16.msra.mxu1 %v5652_v2  ;;  %v5747_v2 = vld [vmem:[%s7119_s5 + $0x284] ss:$8 sps:$4 sm:$0xff]  }
 0x13d   :  { %3414 = vmatpush1.bf16.msra.mxu0 %v5655_v3  ;;  %1513 = vmatprep.subr.bf16.mxu1 %v5660_v4  ;;  %v5750_v3 = vld [vmem:[#allocation2 + $0x584] ss:$8 sps:$4 sm:$0xff]   ;;  %v5745_v4 = vld [vmem:[%s7119_s5 + $0x280] ss:$8 sps:$4 sm:$0xff]  }
 0x13e   :  { %3415 = vmatprep.subr.bf16.mxu0 %v5663_v5  ;;  %v5748_v5 = vld [vmem:[#allocation2 + $0x580] ss:$8 sps:$4 sm:$0xff]  }
 0x140   :  { %1514 = vmatpush1.bf16.msra.mxu1 %v5658_v6  ;;  %v5753_v6 = vld [vmem:[%s7119_s5 + $0x294] ss:$8 sps:$4 sm:$0xff]  }
 0x141   :  { %3416 = vmatpush1.bf16.msra.mxu0 %v5661_v7  ;;  %1515 = vmatprep.subr.bf16.mxu1 %v5666_v8  ;;  %v5756_v7 = vld [vmem:[#allocation2 + $0x594] ss:$8 sps:$4 sm:$0xff]   ;;  %v5751_v8 = vld [vmem:[%s7119_s5 + $0x290] ss:$8 sps:$4 sm:$0xff]  }
 0x142   :  { %3417 = vmatprep.subr.bf16.mxu0 %v5669_v9  ;;  %v5754_v9 = vld [vmem:[#allocation2 + $0x590] ss:$8 sps:$4 sm:$0xff]  }
 0x144   :  { %1516 = vmatpush1.bf16.msra.mxu1 %v5664_v10  ;;  %v5759_v10 = vld [vmem:[%s7119_s5 + $0x2a4] ss:$8 sps:$4 sm:$0xff]  }
 0x145   :  { %3418 = vmatpush1.bf16.msra.mxu0 %v5667_v11  ;;  %1517 = vmatprep.subr.bf16.mxu1 %v5672_v12  ;;  %v5762_v11 = vld [vmem:[#allocation2 + $0x5a4] ss:$8 sps:$4 sm:$0xff]   ;;  %v5757_v12 = vld [vmem:[%s7119_s5 + $0x2a0] ss:$8 sps:$4 sm:$0xff]  }
 0x146   :  { %3419 = vmatprep.subr.bf16.mxu0 %v5675_v13  ;;  %v5760_v13 = vld [vmem:[#allocation2 + $0x5a0] ss:$8 sps:$4 sm:$0xff]  }
 0x148   :  { %1518 = vmatpush1.bf16.msra.mxu1 %v5670_v14  ;;  %v5765_v14 = vld [vmem:[%s7119_s5 + $0x2b4] ss:$8 sps:$4 sm:$0xff]  }
 0x149   :  { %3420 = vmatpush1.bf16.msra.mxu0 %v5673_v15  ;;  %1519 = vmatprep.subr.bf16.mxu1 %v5678_v16  ;;  %v5768_v15 = vld [vmem:[#allocation2 + $0x5b4] ss:$8 sps:$4 sm:$0xff]   ;;  %v5763_v16 = vld [vmem:[%s7119_s5 + $0x2b0] ss:$8 sps:$4 sm:$0xff]  }
 0x14a   :  { %3421 = vmatprep.subr.bf16.mxu0 %v5681_v17  ;;  %v5766_v17 = vld [vmem:[#allocation2 + $0x5b0] ss:$8 sps:$4 sm:$0xff]  }
 0x14c   :  { %1520 = vmatpush1.bf16.msra.mxu1 %v5676_v18  ;;  %v5771_v18 = vld [vmem:[%s7119_s5 + $0x2c4] ss:$8 sps:$4 sm:$0xff]  }
 0x14d   :  { %3422 = vmatpush1.bf16.msra.mxu0 %v5679_v19  ;;  %1521 = vmatprep.subr.bf16.mxu1 %v5684_v20  ;;  %v5774_v19 = vld [vmem:[#allocation2 + $0x5c4] ss:$8 sps:$4 sm:$0xff]   ;;  %v5769_v20 = vld [vmem:[%s7119_s5 + $0x2c0] ss:$8 sps:$4 sm:$0xff]  }
 0x14e   :  { %3423 = vmatprep.subr.bf16.mxu0 %v5687_v21  ;;  %v5772_v21 = vld [vmem:[#allocation2 + $0x5c0] ss:$8 sps:$4 sm:$0xff]  }
 0x150   :  { %1522 = vmatpush1.bf16.msra.mxu1 %v5682_v26  ;;  %v5777_v26 = vld [vmem:[%s7119_s5 + $0x2d4] ss:$8 sps:$4 sm:$0xff]  }
 0x151   :  { %3424 = vmatpush1.bf16.msra.mxu0 %v5685_v27  ;;  %1523 = vmatprep.subr.bf16.mxu1 %v5690_v23  ;;  %v5780_v27 = vld [vmem:[#allocation2 + $0x5d4] ss:$8 sps:$4 sm:$0xff]   ;;  %v5775_v23 = vld [vmem:[%s7119_s5 + $0x2d0] ss:$8 sps:$4 sm:$0xff]  }
 0x152   :  { %3425 = vmatprep.subr.bf16.mxu0 %v5693_v28  ;;  %v5778_v28 = vld [vmem:[#allocation2 + $0x5d0] ss:$8 sps:$4 sm:$0xff]  }
 0x154   :  { %1524 = vmatpush1.bf16.msra.mxu1 %v5688_v30  ;;  %v5783_v30 = vld [vmem:[%s7119_s5 + $0x2e4] ss:$8 sps:$4 sm:$0xff]  }
 0x155   :  { %3426 = vmatpush1.bf16.msra.mxu0 %v5691_v31  ;;  %1536 = vmatprep.subr.bf16.mxu1 %v5699_v32  ;;  %v5786_v31 = vld [vmem:[#allocation2 + $0x5e4] ss:$8 sps:$4 sm:$0xff]   ;;  %v5781_v32 = vld [vmem:[%s7119_s5 + $0x2e0] ss:$8 sps:$4 sm:$0xff]  }
 0x156   :  { %3438 = vmatprep.subr.bf16.mxu0 %v5702_v33  ;;  %v5784_v33 = vld [vmem:[#allocation2 + $0x5e0] ss:$8 sps:$4 sm:$0xff]  }
 0x157   :  { %1526 = vmatmul.mubr.bf16.vlgmr.msra.gmra.mrb[4].mxu1 %v5694_v22  ;;  %v5789_v22 = vld [vmem:[%s7119_s5 + $0x2f4] ss:$8 sps:$4 sm:$0xff]  }
 0x158   :  { %3428 = vmatmul.mubr.bf16.vlgmr.msra.gmra.mrb[0].mxu0 %v4694_v36  ;;  %1537 = vmatpush1.bf16.msra.mxu1 %v5697_v35  ;;  %v5792_v35 = vld [vmem:[#allocation2 + $0x5f4] ss:$8 sps:$4 sm:$0xff]   ;;  %v5787_v36 = vld [vmem:[%s7119_s5 + $0x2f0] ss:$8 sps:$4 sm:$0xff]  }
 0x159   :  { %3439 = vmatpush1.bf16.msra.mxu0 %v5700_v37  ;;  %1538 = vmatprep.subr.bf16.mxu1 %v5705_v38  ;;  %v5790_v37 = vld [vmem:[#allocation2 + $0x5f0] ss:$8 sps:$4 sm:$0xff]   ;;  %v5798_v38 = vld [vmem:[#allocation2 + $0x604] ss:$8 sps:$4 sm:$0xff]  }
 0x15a   :  { %3440 = vmatprep.subr.bf16.mxu0 %v5708_v39  ;;  %1568 = vmatprep.mubr.bf16.mxu1 %v5795_v40  ;;  %v6789_v39 = vld [vmem:[%s7140_s28 + $0x30] sm:$0xff] }
 0x15b   :  { %3470 = vmatprep.mubr.bf16.mxu0 %v4697_v24  ;;  %v6794_v40 = vld [vmem:[%s7140_s28 + $0x70] sm:$0xff] }
 0x15c   :  { %1539 = vmatpush1.bf16.msra.mxu1 %v5703_v41  ;;  %v5793_v41 = vld [vmem:[%s7141_s2 + $0x10] ss:$24 sps:$4 sm:$0xff]  }
 0x15d   :  { %3441 = vmatpush1.bf16.msra.mxu0 %v5706_v42  ;;  %1540 = vmatprep.subr.bf16.mxu1 %v5711_v29  ;;  %v4696_v42 = vcombine.low %v6679_v25, %v6684_v34  ;;  %v5796_v24 = vld [vmem:[#allocation2 + $0x600] ss:$8 sps:$4 sm:$0xff]   ;;  %v4699_v29 = vcombine.high %v6789_v39, %v6794_v40  ;;  %v5799_v34 = vld [vmem:[#allocation2 + $0x610] ss:$8 sps:$4 sm:$0xff]  }
 0x15e   :  { %3442 = vmatprep.subr.bf16.mxu0 %v5714_v43  ;;  %v5801_v43 = vld [vmem:[#allocation2 + $0x614] ss:$8 sps:$4 sm:$0xff]   ;;  %v5894_v25 = vld [vmem:[%s7124_s10 + $0x48] sm:$0xff]  }
 0x160   :  { %1541 = vmatpush1.bf16.msra.mxu1 %v5709_v44  ;;  %v5892_v44 = vld [vmem:[%s7124_s10 + $0x40] sm:$0xff]  }
 0x161   :  { %3443 = vmatpush1.bf16.msra.mxu0 %v5712_v45  ;;  %1542 = vmatprep.subr.bf16.mxu1 %v5717_v46  ;;  %v5893_v45 = vld [vmem:[%s7124_s10] sm:$0xff]   ;;  %v5804_v46 = vld [vmem:[#allocation2 + $0x624] ss:$8 sps:$4 sm:$0xff]  }
 0x162   :  { %3444 = vmatprep.subr.bf16.mxu0 %v5720_v47  ;;  %v5895_v47 = vld [vmem:[%s7124_s10 + $0x8] sm:$0xff]  }
 0x164   :  { %1543 = vmatpush1.bf16.msra.mxu1 %v5715_v48  ;;  %v5896_v48 = vld [vmem:[%s7124_s10 + $0x50] sm:$0xff]  }
 0x165   :  { %3445 = vmatpush1.bf16.msra.mxu0 %v5718_v49  ;;  %1544 = vmatprep.subr.bf16.mxu1 %v5723_v50  ;;  %v5802_v49 = vld [vmem:[#allocation2 + $0x620] ss:$8 sps:$4 sm:$0xff]   ;;  %v5807_v50 = vld [vmem:[#allocation2 + $0x634] ss:$8 sps:$4 sm:$0xff]  }
 0x166   :  { %3446 = vmatprep.subr.bf16.mxu0 %v5726_v51  ;;  %v177_v51 = vlaneseq }
 0x168   :  { %1545 = vmatpush1.bf16.msra.mxu1 %v5721_v52  ;;  %v5897_v52 = vld [vmem:[%s7124_s10 + $0x10] sm:$0xff]  }
 0x169   :  { %3447 = vmatpush1.bf16.msra.mxu0 %v5724_v53  ;;  %1546 = vmatprep.subr.bf16.mxu1 %v5729_v54  ;;  %v5898_v53 = vld [vmem:[%s7124_s10 + $0x58] sm:$0xff]  }
 0x16a   :  { %3448 = vmatprep.subr.bf16.mxu0 %v5732_v55  ;;  %v5805_v54 = vld [vmem:[#allocation2 + $0x630] ss:$8 sps:$4 sm:$0xff]   ;;  %v5810_v55 = vld [vmem:[#allocation2 + $0x644] ss:$8 sps:$4 sm:$0xff]  }
 0x16c   :  { %1547 = vmatpush1.bf16.msra.mxu1 %v5727_v56  ;;  %v178_v56 = vshrl.u32 %v177_v51, 7 }
 0x16d   :  { %3449 = vmatpush1.bf16.msra.mxu0 %v5730_v57  ;;  %1548 = vmatprep.subr.bf16.mxu1 %v5735_v58  ;;  %v5899_v57 = vld [vmem:[%s7124_s10 + $0x18] sm:$0xff]   ;;  %v5900_v58 = vld [vmem:[%s7124_s10 + $0x60] sm:$0xff]  }
 0x16e   :  { %3450 = vmatprep.subr.bf16.mxu0 %v5738_v59  ;;  %v5808_v59 = vld [vmem:[#allocation2 + $0x640] ss:$8 sps:$4 sm:$0xff]  }
 0x170   :  { %1549 = vmatpush1.bf16.msra.mxu1 %v5733_v60  ;;  %v6831_v60 = vsub.s32 0, %v178_v56 }
 0x171   :  { %3451 = vmatpush1.bf16.msra.mxu0 %v5736_v61  ;;  %1550 = vmatprep.subr.bf16.mxu1 %v5741_v62  ;;  %v5813_v61 = vld [vmem:[#allocation2 + $0x654] ss:$8 sps:$4 sm:$0xff]   ;;  %v175_v62 = vld [vmem:[%s7118_s4] sm:$0x3] }
 0x172   :  { %3452 = vmatprep.subr.bf16.mxu0 %v5744_v63  ;;  %v6836_v63 = vsub.s32 1, %v178_v56  ;;  %v5862_v56 = vld [vmem:[#allocation2 + $0x760] ss:$8 sps:$4 sm:$0xff]  }
 0x174   :  { %1551 = vmatpush1.bf16.msra.mxu1 %v5739_v0  ;;  %v5901_v0 = vld [vmem:[%s7124_s10 + $0x20] sm:$0xff]  }
 0x175   :  { %3453 = vmatpush1.bf16.msra.mxu0 %v5742_v1  ;;  %1552 = vmatprep.subr.bf16.mxu1 %v5747_v2  ;;  %v5902_v1 = vld [vmem:[%s7124_s10 + $0x68] sm:$0xff]   ;;  %v5811_v2 = vld [vmem:[#allocation2 + $0x650] ss:$8 sps:$4 sm:$0xff]  }
 0x176   :  { %3454 = vmatprep.subr.bf16.mxu0 %v5750_v3  ;;  %v180_v3 = vrot.slane %v175_v62, %v6831_v60 }
 0x178   :  { %1553 = vmatpush1.bf16.msra.mxu1 %v5745_v4  ;;  %v5816_v4 = vld [vmem:[#allocation2 + $0x664] ss:$8 sps:$4 sm:$0xff]  }
 0x179   :  { %3455 = vmatpush1.bf16.msra.mxu0 %v5748_v5  ;;  %1554 = vmatprep.subr.bf16.mxu1 %v5753_v6  ;;  %v184_v6 = vrot.slane %v175_v62, %v6836_v63  ;;  %v5908_v62 = vld [vmem:[%s7123_s9 + $0x40] sm:$0xff]  }
 0x17a   :  { %3456 = vmatprep.subr.bf16.mxu0 %v5756_v7  ;;  %v5903_v7 = vld [vmem:[%s7124_s10 + $0x28] sm:$0xff]  }
 0x17c   :  { %1555 = vmatpush1.bf16.msra.mxu1 %v5751_v8 }
 0x17d   :  { %3457 = vmatpush1.bf16.msra.mxu0 %v5754_v9  ;;  %1556 = vmatprep.subr.bf16.mxu1 %v5759_v10  ;;  %v5814_v10 = vld [vmem:[#allocation2 + $0x660] ss:$8 sps:$4 sm:$0xff]  }
 0x17e   :  { %3458 = vmatprep.subr.bf16.mxu0 %v5762_v11 }
 0x180   :  { %1557 = vmatpush1.bf16.msra.mxu1 %v5757_v12 }
 0x181   :  { %3459 = vmatpush1.bf16.msra.mxu0 %v5760_v13  ;;  %1558 = vmatprep.subr.bf16.mxu1 %v5765_v14  ;;  %v5819_v14 = vld [vmem:[#allocation2 + $0x674] ss:$8 sps:$4 sm:$0xff]  }
 0x182   :  { %3460 = vmatprep.subr.bf16.mxu0 %v5768_v15 }
 0x184   :  { %1559 = vmatpush1.bf16.msra.mxu1 %v5763_v16 }
 0x185   :  { %3461 = vmatpush1.bf16.msra.mxu0 %v5766_v17  ;;  %1560 = vmatprep.subr.bf16.mxu1 %v5771_v18 }
 0x186   :  { %3462 = vmatprep.subr.bf16.mxu0 %v5774_v19  ;;  %v5817_v19 = vld [vmem:[#allocation2 + $0x670] ss:$8 sps:$4 sm:$0xff]  }
 0x188   :  { %1561 = vmatpush1.bf16.msra.mxu1 %v5769_v20  ;;  %v5822_v20 = vld [vmem:[#allocation2 + $0x684] ss:$8 sps:$4 sm:$0xff]  }
 0x189   :  { %3463 = vmatpush1.bf16.msra.mxu0 %v5772_v21  ;;  %1562 = vmatprep.subr.bf16.mxu1 %v5777_v26  ;;  %v5820_v21 = vld [vmem:[#allocation2 + $0x680] ss:$8 sps:$4 sm:$0xff]   ;;  %v5825_v26 = vld [vmem:[#allocation2 + $0x694] ss:$8 sps:$4 sm:$0xff]  }
 0x18a   :  { %3464 = vmatprep.subr.bf16.mxu0 %v5780_v27  ;;  %v5823_v27 = vld [vmem:[#allocation2 + $0x690] ss:$8 sps:$4 sm:$0xff]  }
 0x18c   :  { %1563 = vmatpush1.bf16.msra.mxu1 %v5775_v23  ;;  %v5828_v23 = vld [vmem:[#allocation2 + $0x6a4] ss:$8 sps:$4 sm:$0xff]  }
 0x18d   :  { %3465 = vmatpush1.bf16.msra.mxu0 %v5778_v28  ;;  %1564 = vmatprep.subr.bf16.mxu1 %v5783_v30  ;;  %v5826_v28 = vld [vmem:[#allocation2 + $0x6a0] ss:$8 sps:$4 sm:$0xff]   ;;  %v5831_v30 = vld [vmem:[#allocation2 + $0x6b4] ss:$8 sps:$4 sm:$0xff]  }
 0x18e   :  { %3466 = vmatprep.subr.bf16.mxu0 %v5786_v31  ;;  %v5829_v31 = vld [vmem:[#allocation2 + $0x6b0] ss:$8 sps:$4 sm:$0xff]  }
 0x190   :  { %1565 = vmatpush1.bf16.msra.mxu1 %v5781_v32  ;;  %v5834_v32 = vld [vmem:[#allocation2 + $0x6c4] ss:$8 sps:$4 sm:$0xff]  }
 0x191   :  { %3467 = vmatpush1.bf16.msra.mxu0 %v5784_v33  ;;  %1566 = vmatprep.subr.bf16.mxu1 %v5789_v22  ;;  %v5832_v33 = vld [vmem:[#allocation2 + $0x6c0] ss:$8 sps:$4 sm:$0xff]   ;;  %v5837_v22 = vld [vmem:[#allocation2 + $0x6d4] ss:$8 sps:$4 sm:$0xff]  }
 0x192   :  { %3468 = vmatprep.subr.bf16.mxu0 %v5792_v35  ;;  %v5835_v35 = vld [vmem:[#allocation2 + $0x6d0] ss:$8 sps:$4 sm:$0xff]  }
 0x194   :  { %1567 = vmatpush1.bf16.msra.mxu1 %v5787_v36  ;;  %v5840_v36 = vld [vmem:[#allocation2 + $0x6e4] ss:$8 sps:$4 sm:$0xff]  }
 0x195   :  { %3469 = vmatpush1.bf16.msra.mxu0 %v5790_v37  ;;  %5022 = vmatprep.subr.bf16.mxu1 %v5892_v44  ;;  %v5838_v37 = vld [vmem:[#allocation2 + $0x6e0] ss:$8 sps:$4 sm:$0xff]  }
 0x196   :  { %3481 = vmatprep.subr.bf16.mxu0 %v5798_v38  ;;  %v5843_v38 = vld [vmem:[#allocation2 + $0x6f4] ss:$8 sps:$4 sm:$0xff]   ;;  %v5844_v44 = vld [vmem:[#allocation2 + $0x700] ss:$8 sps:$4 sm:$0xff]  }
 0x197   :  { %1569 = vmatmul.mubr.bf16.vlgmr.msra.gmra.mrb[4].mxu1 %v5793_v41  ;;  %v5841_v41 = vld [vmem:[#allocation2 + $0x6f0] ss:$8 sps:$4 sm:$0xff]  }
 0x198   :  { %3471 = vmatmul.mubr.bf16.vlgmr.msra.gmra.mrb[0].mxu0 %v4696_v42  ;;  %5023 = vmatpush3.bf16.msra.mxu1 %v5893_v45  ;;  %v5846_v42 = vld [vmem:[#allocation2 + $0x704] ss:$8 sps:$4 sm:$0xff]  }
 0x199   :  { %3482 = vmatpush1.bf16.msra.mxu0 %v5796_v24  ;;  %3513 = vmatprep.mubr.bf16.mxu0 %v4699_v29  ;;  %v6864_v24 = vld [vmem:[%s7140_s28 + $0x38] sm:$0xff] }
 0x19a   :  { %3483 = vmatprep.subr.bf16.mxu0 %v5801_v43  ;;  %5024 = vmatprep.subr.bf16.mxu1 %v5894_v25  ;;  %v6869_v29 = vld [vmem:[%s7140_s28 + $0x78] sm:$0xff]  ;;  %v4698_v43 = vcombine.low %v6789_v39, %v6794_v40  ;;  %v5858_v39 = vld [vmem:[#allocation2 + $0x744] ss:$8 sps:$4 sm:$0xff]   ;;  %v5856_v40 = vld [vmem:[#allocation2 + $0x740] ss:$8 sps:$4 sm:$0xff]  }
 0x19b   :  { %v4701_v45 = vcombine.high %v6864_v24, %v6869_v29  ;;  %v5849_v25 = vld [vmem:[#allocation2 + $0x714] ss:$8 sps:$4 sm:$0xff]  }
 0x19c   :  { %5025 = vmatpush3.bf16.msra.mxu1 %v5895_v47  ;;  %v5850_v47 = vld [vmem:[#allocation2 + $0x720] ss:$8 sps:$4 sm:$0xff]  }
 0x19d   :  { %3484 = vmatpush1.bf16.msra.mxu0 %v5799_v34  ;;  %5026 = vmatprep.subr.bf16.mxu1 %v5896_v48  ;;  %v5847_v34 = vld [vmem:[#allocation2 + $0x710] ss:$8 sps:$4 sm:$0xff]   ;;  %v5855_v48 = vld [vmem:[#allocation2 + $0x734] ss:$8 sps:$4 sm:$0xff]  }
 0x19e   :  { %3485 = vmatprep.subr.bf16.mxu0 %v5804_v46  ;;  %v5852_v46 = vld [vmem:[#allocation2 + $0x724] ss:$8 sps:$4 sm:$0xff]  }
 0x1a0   :  { %5027 = vmatpush3.bf16.msra.mxu1 %v5897_v52  ;;  %v5859_v52 = vld [vmem:[#allocation2 + $0x750] ss:$8 sps:$4 sm:$0xff]  }
 0x1a1   :  { %3486 = vmatpush1.bf16.msra.mxu0 %v5802_v49  ;;  %5028 = vmatprep.subr.bf16.mxu1 %v5898_v53  ;;  %v5853_v49 = vld [vmem:[#allocation2 + $0x730] ss:$8 sps:$4 sm:$0xff]   ;;  %v5904_v53 = vld [vmem:[%s7124_s10 + $0x70] sm:$0xff]  }
 0x1a2   :  { %3487 = vmatprep.subr.bf16.mxu0 %v5807_v50  ;;  %v5861_v50 = vld [vmem:[#allocation2 + $0x754] ss:$8 sps:$4 sm:$0xff]  }
 0x1a4   :  { %5029 = vmatpush3.bf16.msra.mxu1 %v5899_v57  ;;  %v5906_v57 = vld [vmem:[%s7124_s10 + $0x78] sm:$0xff]  }
 0x1a5   :  { %3488 = vmatpush1.bf16.msra.mxu0 %v5805_v54  ;;  %5030 = vmatprep.subr.bf16.mxu1 %v5900_v58  ;;  %v5864_v54 = vld [vmem:[#allocation2 + $0x764] ss:$8 sps:$4 sm:$0xff]   ;;  %v5867_v58 = vld [vmem:[#allocation2 + $0x774] ss:$8 sps:$4 sm:$0xff]  }
 0x1a6   :  { %3489 = vmatprep.subr.bf16.mxu0 %v5810_v55  ;;  %v5905_v55 = vld [vmem:[%s7124_s10 + $0x30] sm:$0xff]  }
 0x1a8   :  { %5031 = vmatpush3.bf16.msra.mxu1 %v5901_v0  ;;  %v5870_v0 = vld [vmem:[#allocation2 + $0x784] ss:$8 sps:$4 sm:$0xff]  }
 0x1a9   :  { %3490 = vmatpush1.bf16.msra.mxu0 %v5808_v59  ;;  %5032 = vmatprep.subr.bf16.mxu1 %v5902_v1  ;;  %v5907_v59 = vld [vmem:[%s7124_s10 + $0x38] sm:$0xff]   ;;  %v5868_v1 = vld [vmem:[#allocation2 + $0x780] ss:$8 sps:$4 sm:$0xff]  }
 0x1aa   :  { %3491 = vmatprep.subr.bf16.mxu0 %v5813_v61  ;;  %v817_v5 = vpop.f32.mrb[0].mxu1  ;;  %v5865_v61 = vld [vmem:[#allocation2 + $0x770] ss:$8 sps:$4 sm:$0xff]  }
 0x1ab   :  { %v819_v8 = vpop.f32.mrb[1].mxu1  ;;  %v6849_v11 = vadd.f32 %v817_v5, %v180_v3  ;;  %v5874_v5 = vld [vmem:[#allocation2 + $0x7a0] ss:$8 sps:$4 sm:$0xff]  }
 0x1ac   :  { %v821_v9 = vpop.f32.mrb[2].mxu1  ;;  %v6853_v15 = vadd.f32 %v819_v8, %v184_v6  ;;  %5033 = vmatpush3.bf16.msra.mxu1 %v5903_v7  ;;  %v5877_v7 = vld [vmem:[#allocation2 + $0x7b0] ss:$8 sps:$4 sm:$0xff]   ;;  %v5882_v8 = vld [vmem:[#allocation2 + $0x7c4] ss:$8 sps:$4 sm:$0xff]  }
 0x1ad   :  { %3492 = vmatpush1.bf16.msra.mxu0 %v5811_v2  ;;  %v6851_v12 = vadd.f32 %v821_v9, %v180_v3  ;;  %v823_v13 = vpop.f32.mrb[3].mxu1  ;;  %5034 = vmatprep.subr.bf16.mxu1 %v5904_v53  ;;  %v5873_v2 = vld [vmem:[#allocation2 + $0x794] ss:$8 sps:$4 sm:$0xff]   ;;  %v5871_v3 = vld [vmem:[#allocation2 + $0x790] ss:$8 sps:$4 sm:$0xff]   ;;  %v5928_v53 = vld [vmem:[%s7125_s11 + $0x50] sm:$0xff]  }
 0x1ae   :  { %3493 = vmatprep.subr.bf16.mxu0 %v5816_v4  ;;  %v6855_v16 = vadd.f32 %v823_v13, %v184_v6  ;;  %v5876_v4 = vld [vmem:[#allocation2 + $0x7a4] ss:$8 sps:$4 sm:$0xff]   ;;  %v5879_v6 = vld [vmem:[#allocation2 + $0x7b4] ss:$8 sps:$4 sm:$0xff]   ;;  %v5880_v9 = vld [vmem:[#allocation2 + $0x7c0] ss:$8 sps:$4 sm:$0xff]  }
 0x1af   :  { %v3567_v17 = vpack.c.bf16 %v6851_v12, %v6849_v11  ;;  %v5883_v13 = vld [vmem:[#allocation2 + $0x7d0] ss:$8 sps:$4 sm:$0xff]  }
 0x1b0   :  { %v3568_v18 = vpack.c.bf16 %v6855_v16, %v6853_v15  ;;  %5035 = vmatpush3.bf16.msra.mxu1 %v5905_v55  ;;  %v5914_v15 = vld [vmem:[%s7123_s9 + $0x58] sm:$0xff]   ;;  %v5933_v55 = vld [vmem:[%s7125_s11 + $0x20] sm:$0xff]  }
 0x1b1   :  { %3494 = vmatpush1.bf16.msra.mxu0 %v5814_v10  ;;  %5036 = vmatprep.subr.bf16.mxu1 %v5906_v57  ;;  %v5885_v10 = vld [vmem:[#allocation2 + $0x7d4] ss:$8 sps:$4 sm:$0xff]   ;;  %v5935_v57 = vld [vmem:[%s7125_s11 + $0x28] sm:$0xff]  }
 0x1b2   :  { %3495 = vmatprep.subr.bf16.mxu0 %v5819_v14  ;;  %v5888_v14 = vld [vmem:[#allocation2 + $0x7e4] ss:$8 sps:$4 sm:$0xff]   ;;  %v5915_v16 = vld [vmem:[%s7123_s9 + $0x18] sm:$0xff]  }
 0x1b3   :  { %v5930_v11 = vld [vmem:[%s7125_s11 + $0x58] sm:$0xff]  }
 0x1b4   :  { %5037 = vmatpush3.bf16.msra.mxu1 %v5907_v59  ;;  %v5931_v12 = vld [vmem:[%s7125_s11 + $0x18] sm:$0xff]   ;;  %v5937_v59 = vld [vmem:[%s7125_s11 + $0x30] sm:$0xff]  }
 0x1b5   :  { %3496 = vmatpush1.bf16.msra.mxu0 %v5817_v19  ;;  %5044 = vmatprep.subr.bf16.mxu1 %v5908_v62  ;;  %v5886_v19 = vld [vmem:[#allocation2 + $0x7e0] ss:$8 sps:$4 sm:$0xff]   ;;  %v5939_v62 = vld [vmem:[%s7125_s11 + $0x38] sm:$0xff]  }
 0x1b6   :  { %3497 = vmatprep.subr.bf16.mxu0 %v5822_v20  ;;  %v5891_v20 = vld [vmem:[#allocation2 + $0x7f4] ss:$8 sps:$4 sm:$0xff]  }
 0x1b9   :  { %3498 = vmatpush1.bf16.msra.mxu0 %v5820_v21  ;;  %v5889_v21 = vld [vmem:[#allocation2 + $0x7f0] ss:$8 sps:$4 sm:$0xff]  }
 0x1ba   :  { %3499 = vmatprep.subr.bf16.mxu0 %v5825_v26  ;;  %v4700_v26 = vcombine.low %v6864_v24, %v6869_v29  ;;  %v5910_v24 = vld [vmem:[%s7123_s9 + $0x48] sm:$0xff]  }
 0x1bb   :  { %v5911_v29 = vld [vmem:[%s7123_s9 + $0x8] sm:$0xff]  }
 0x1bd   :  { %3500 = vmatpush1.bf16.msra.mxu0 %v5823_v27  ;;  %v928_v27 = vld [vmem:[%s7120_s6] sm:$0x3] }
 0x1be   :  { %3501 = vmatprep.subr.bf16.mxu0 %v5828_v23  ;;  %v933_v23 = vrot.slane %v928_v27, %v6831_v60 }
 0x1c1   :  { %3502 = vmatpush1.bf16.msra.mxu0 %v5826_v28 }
 0x1c2   :  { %3503 = vmatprep.subr.bf16.mxu0 %v5831_v30  ;;  %v937_v30 = vrot.slane %v928_v27, %v6836_v63 }
 0x1c5   :  { %3504 = vmatpush1.bf16.msra.mxu0 %v5829_v31 }
 0x1c6   :  { %3505 = vmatprep.subr.bf16.mxu0 %v5834_v32 }
 0x1c9   :  { %3506 = vmatpush1.bf16.msra.mxu0 %v5832_v33 }
 0x1ca   :  { %3507 = vmatprep.subr.bf16.mxu0 %v5837_v22 }
 0x1cd   :  { %3508 = vmatpush1.bf16.msra.mxu0 %v5835_v35 }
 0x1ce   :  { %3509 = vmatprep.subr.bf16.mxu0 %v5840_v36 }
 0x1d1   :  { %3510 = vmatpush1.bf16.msra.mxu0 %v5838_v37 }
 0x1d2   :  { %3511 = vmatprep.subr.bf16.mxu0 %v5843_v38 }
 0x1d5   :  { %3512 = vmatpush1.bf16.msra.mxu0 %v5841_v41 }
 0x1d6   :  { %3524 = vmatprep.subr.bf16.mxu0 %v5846_v42  ;;  %v5909_v42 = vld [vmem:[%s7123_s9] sm:$0xff]  }
 0x1d8   :  { %3514 = vmatmul.mubr.bf16.vlgmr.msra.gmra.mrb[0].mxu0 %v4698_v43  ;;  %v5912_v43 = vld [vmem:[%s7123_s9 + $0x50] sm:$0xff]  }
 0x1d9   :  { %3525 = vmatpush1.bf16.msra.mxu0 %v5844_v44  ;;  %3556 = vmatprep.mubr.bf16.mxu0 %v4701_v45  ;;  %v5913_v44 = vld [vmem:[%s7123_s9 + $0x10] sm:$0xff]   ;;  %v5917_v45 = vld [vmem:[%s7123_s9 + $0x20] sm:$0xff]  }
 0x1da   :  { %3526 = vmatprep.subr.bf16.mxu0 %v5849_v25  ;;  %v5918_v25 = vld [vmem:[%s7123_s9 + $0x68] sm:$0xff]  }
 0x1dd   :  { %3527 = vmatpush1.bf16.msra.mxu0 %v5847_v34  ;;  %v5919_v34 = vld [vmem:[%s7123_s9 + $0x28] sm:$0xff]  }
 0x1de   :  { %3528 = vmatprep.subr.bf16.mxu0 %v5852_v46  ;;  %v5920_v46 = vld [vmem:[%s7123_s9 + $0x70] sm:$0xff]  }
 0x1e1   :  { %3529 = vmatpush1.bf16.msra.mxu0 %v5850_v47  ;;  %v5921_v47 = vld [vmem:[%s7123_s9 + $0x30] sm:$0xff]  }
 0x1e2   :  { %3530 = vmatprep.subr.bf16.mxu0 %v5855_v48  ;;  %v5922_v48 = vld [vmem:[%s7123_s9 + $0x78] sm:$0xff]  }
 0x1e5   :  { %3531 = vmatpush1.bf16.msra.mxu0 %v5853_v49  ;;  %v5923_v49 = vld [vmem:[%s7123_s9 + $0x38] sm:$0xff]  }
 0x1e6   :  { %3532 = vmatprep.subr.bf16.mxu0 %v5858_v39  ;;  %v5924_v39 = vld [vmem:[%s7125_s11 + $0x40] sm:$0xff]  }
 0x1e9   :  { %3533 = vmatpush1.bf16.msra.mxu0 %v5856_v40  ;;  %v5925_v40 = vld [vmem:[%s7125_s11] sm:$0xff]  }
 0x1ea   :  { %3534 = vmatprep.subr.bf16.mxu0 %v5861_v50  ;;  %v5926_v50 = vld [vmem:[%s7125_s11 + $0x48] sm:$0xff]  }
 0x1ed   :  { %3535 = vmatpush1.bf16.msra.mxu0 %v5859_v52  ;;  %v5927_v52 = vld [vmem:[%s7125_s11 + $0x8] sm:$0xff]  }
 0x1ee   :  { %3536 = vmatprep.subr.bf16.mxu0 %v5864_v54  ;;  %v5929_v54 = vld [vmem:[%s7125_s11 + $0x10] sm:$0xff]  }
 0x1f1   :  { %3537 = vmatpush1.bf16.msra.mxu0 %v5862_v56  ;;  %v5934_v56 = vld [vmem:[%s7125_s11 + $0x68] sm:$0xff]  }
 0x1f2   :  { %3538 = vmatprep.subr.bf16.mxu0 %v5867_v58  ;;  %v5936_v58 = vld [vmem:[%s7125_s11 + $0x70] sm:$0xff]  }
 0x1f5   :  { %3539 = vmatpush1.bf16.msra.mxu0 %v5865_v61  ;;  %v5938_v61 = vld [vmem:[%s7125_s11 + $0x78] sm:$0xff]  }
 0x1f6   :  { %3540 = vmatprep.subr.bf16.mxu0 %v5870_v0  ;;  %v1851_v0 = vld [vmem:[%s7122_s8] sm:$0x3] }
 0x1f9   :  { %3541 = vmatpush1.bf16.msra.mxu0 %v5868_v1  ;;  %v1856_v1 = vrot.slane %v1851_v0, %v6831_v60 }
 0x1fa   :  { %3542 = vmatprep.subr.bf16.mxu0 %v5873_v2 }
 0x1fd   :  { %3543 = vmatpush1.bf16.msra.mxu0 %v5871_v3  ;;  %v1860_v3 = vrot.slane %v1851_v0, %v6836_v63 }
 0x1fe   :  { %3544 = vmatprep.subr.bf16.mxu0 %v5876_v4 }
 0x201   :  { %3545 = vmatpush1.bf16.msra.mxu0 %v5874_v5 }
 0x202   :  { %3546 = vmatprep.subr.bf16.mxu0 %v5879_v6 }
 0x205   :  { %3547 = vmatpush1.bf16.msra.mxu0 %v5877_v7 }
 0x206   :  { %3548 = vmatprep.subr.bf16.mxu0 %v5882_v8 }
 0x209   :  { %3549 = vmatpush1.bf16.msra.mxu0 %v5880_v9 }
 0x20a   :  { %3550 = vmatprep.subr.bf16.mxu0 %v5885_v10 }
 0x20d   :  { %3551 = vmatpush1.bf16.msra.mxu0 %v5883_v13 }
 0x20e   :  { %3552 = vmatprep.subr.bf16.mxu0 %v5888_v14 }
 0x211   :  { %3553 = vmatpush1.bf16.msra.mxu0 %v5886_v19 }
 0x212   :  { %3554 = vmatprep.subr.bf16.mxu0 %v5891_v20 }
 0x215   :  { %3555 = vmatpush1.bf16.msra.mxu0 %v5889_v21 }
 0x218   :  { %3557 = vmatmul.mubr.bf16.vlgmr.msra.gmra.mrb[0].mxu0 %v4700_v26 }
 0x26a   :  { %v1570_v28 = vpop.f32.mrb[4].mxu1 }
 0x26b   :  { %v1572_v31 = vpop.f32.mrb[5].mxu1  ;;  %v5126_v33 = vadd.f32 %v1570_v28, %v933_v23 }
 0x26c   :  { %v1574_v32 = vpop.f32.mrb[6].mxu1  ;;  %v5127_v36 = vadd.f32 %v1572_v31, %v937_v30 }
 0x26d   :  { %v5128_v22 = vadd.f32 %v1574_v32, %v933_v23  ;;  %v1576_v35 = vpop.f32.mrb[7].mxu1 }
 0x26e   :  { %v5129_v37 = vadd.f32 %v1576_v35, %v937_v30 }
 0x26f   :  { %v3601_v38 = vpack.c.bf16 %v5128_v22, %v5126_v33 }
 0x270   :  { %v3602_v41 = vpack.c.bf16 %v5129_v37, %v5127_v36 }
 0x272   :  { %3763 = vmatprep.mubr.bf16.mxu1 %v3602_v41 }
 0x273   :  { %3764 = vmatmul.mubr.bf16.vlgmr.msra.gmra.mrb[8].mxu1 %v3601_v38 }
 0x274   :  { %5045 = vmatpush3.bf16.msra.mxu1 %v5909_v42  ;;  %3900 = vmatprep.mubr.bf16.mxu1 %v3568_v18  ;;  %v5916_v18 = vld [vmem:[%s7123_s9 + $0x60] sm:$0xff]  }
 0x275   :  { %5046 = vmatprep.subr.bf16.mxu1 %v5910_v24  ;;  %v5006_v42 = vld [vmem:[%s7126_s12] ss:$0 sm:$0xff] }
 0x278   :  { %5047 = vmatpush3.bf16.msra.mxu1 %v5911_v29 }
 0x279   :  { %5048 = vmatprep.subr.bf16.mxu1 %v5912_v43 }
 0x27c   :  { %5049 = vmatpush3.bf16.msra.mxu1 %v5913_v44 }
 0x27d   :  { %5050 = vmatprep.subr.bf16.mxu1 %v5914_v15 }
 0x280   :  { %5051 = vmatpush3.bf16.msra.mxu1 %v5915_v16 }
 0x281   :  { %5052 = vmatprep.subr.bf16.mxu1 %v5916_v18 }
 0x284   :  { %5053 = vmatpush3.bf16.msra.mxu1 %v5917_v45  ;;  %v4091_v45 = vld [vmem:[%s7127_s13] sm:$0xff] }
 0x285   :  { %5054 = vmatprep.subr.bf16.mxu1 %v5918_v25  ;;  %v4092_v25 = vld [vmem:[%s7127_s13 + $0x8] sm:$0x7f] }
 0x288   :  { %5055 = vmatpush3.bf16.msra.mxu1 %v5919_v34  ;;  %v5110_v34 = vpack.c.bf16 %v4092_v25, %v4091_v45 }
 0x289   :  { %5056 = vmatprep.subr.bf16.mxu1 %v5920_v46 }
 0x28c   :  { %5057 = vmatpush3.bf16.msra.mxu1 %v5921_v47 }
 0x28d   :  { %5058 = vmatprep.subr.bf16.mxu1 %v5922_v48 }
 0x290   :  { %5059 = vmatpush3.bf16.msra.mxu1 %v5923_v49 }
 0x291   :  { %5066 = vmatprep.subr.bf16.mxu1 %v5924_v39 }
 0x293   :  { %3901 = vmatmul.mubr.bf16.vlgmr.msra.gmra.mrb[12].mxu1 %v3567_v17  ;;  %v5932_v17 = vld [vmem:[%s7125_s11 + $0x60] sm:$0xff]  }
 0x294   :  { %5067 = vmatpush3.bf16.msra.mxu1 %v5925_v40 }
 0x295   :  { %5068 = vmatprep.subr.bf16.mxu1 %v5926_v50 }
 0x298   :  { %5069 = vmatpush3.bf16.msra.mxu1 %v5927_v52 }
 0x299   :  { %5070 = vmatprep.subr.bf16.mxu1 %v5928_v53 }
 0x29c   :  { %5071 = vmatpush3.bf16.msra.mxu1 %v5929_v54 }
 0x29d   :  { %5072 = vmatprep.subr.bf16.mxu1 %v5930_v11 }
 0x2a0   :  { %5073 = vmatpush3.bf16.msra.mxu1 %v5931_v12 }
 0x2a1   :  { %5074 = vmatprep.subr.bf16.mxu1 %v5932_v17 }
 0x2a4   :  { %5075 = vmatpush3.bf16.msra.mxu1 %v5933_v55 }
 0x2a5   :  { %5076 = vmatprep.subr.bf16.mxu1 %v5934_v56 }
 0x2a8   :  { %5077 = vmatpush3.bf16.msra.mxu1 %v5935_v57 }
 0x2a9   :  { %5078 = vmatprep.subr.bf16.mxu1 %v5936_v58 }
 0x2ac   :  { %5079 = vmatpush3.bf16.msra.mxu1 %v5937_v59 }
 0x2ad   :  { %5080 = vmatprep.subr.bf16.mxu1 %v5938_v61  ;;  %v4303_v61 = vld [vmem:[%s7130_s16 + $0x8] sm:$0xff] }
 0x2ae   :  { %vm4312_vm5 = vcmp.ge.s32.totalorder %v4303_v61, 0 }
 0x2b0   :  { %5081 = vmatpush3.bf16.msra.mxu1 %v5939_v62  ;;  %v5013_v62 = vld [vmem:[%s7128_s14] ss:$0 sm:$0xff] }
 0x2b1   :  { %5112 = vmatprep.subr.msk.bf16.mxu1 %vm7012_vm3, %v5110_v34  ;;  %vm4310_vm4 = vcmp.eq.s32.totalorder %v5013_v62, %v4303_v61 }
 0x2b2   :  { %vm4314_vm8 = vmand %vm4310_vm4, %vm4312_vm5 }
 0x2eb   :  { %v3558_v2 = vpop.f32.mrb[0].mxu0 }
 0x2ec   :  { %v3560_v4 = vpop.f32.mrb[1].mxu0  ;;  %v5130_v6 = vadd.f32 %v3558_v2, %v1856_v1 }
 0x2ed   :  { %v3562_v5 = vpop.f32.mrb[2].mxu0  ;;  %v5131_v9 = vadd.f32 %v3560_v4, %v1860_v3  ;;  %v5994_v4 = vmov 0.0  }
 0x2ee   :  { %v5132_v7 = vadd.f32 %v3562_v5, %v1856_v1  ;;  %v3564_v8 = vpop.f32.mrb[3].mxu0  ;;  %v4302_v1 = vld [vmem:[%s7130_s16] sm:$0xff]  ;;  %v4316_v5 = vsel %vm4314_vm8, 1.0, %v5994_v4 }
 0x2ef   :  { %v5133_v10 = vadd.f32 %v3564_v8, %v1860_v3  ;;  %vm4309_vm6 = vcmp.eq.s32.totalorder %v5013_v62, %v4302_v1  ;;  %vm4311_vm7 = vcmp.ge.s32.totalorder %v4302_v1, 0  ;;  %v7044_v3 = vand.u32 127, %v177_v51 }
 0x2f0   :  { %v3909_v13 = vpack.c.bf16 %v5132_v7, %v5130_v6  ;;  %vm4313_vm9 = vmand %vm4309_vm6, %vm4311_vm7  ;;  %v5014_v6 = vld [vmem:[%s7129_s15] ss:$0 sm:$0xff] }
 0x2f1   :  { %v3910_v14 = vpack.c.bf16 %v5133_v10, %v5131_v9  ;;  %vm4367_vm10 = vcmp.ge.s32.totalorder %v7044_v3, 3  ;;  %vm4368_vm11 = vcmp.lt.s32.totalorder %v7044_v3, 9  ;;  %v4315_v7 = vsel %vm4313_vm9, 1.0, %v5994_v4 }
 0x2f2   :  { %v4325_v8 = vmul.f32 %v5014_v6, %v4316_v5  ;;  %vm4330_vm12 = vcmp.lt.s32.totalorder %v7044_v3, 3  ;;  %vm4369_vm13 = vmand %vm4367_vm10, %vm4368_vm11  ;;  %v4324_v9 = vmul.f32 %v5014_v6, %v4315_v7  ;;  %vm4406_vm14 = vcmp.ge.s32.totalorder %v7044_v3, 9 }
 0x2f3   :  { %4071 = vmatprep.mubr.bf16.mxu1 %v3910_v14  ;;  %vm4453_vm15 = vcmp.eq.s32.totalorder %v7044_v3, 1  ;;  %vm4448_vm1 = vcmp.eq.s32.totalorder %v7044_v3, 0  ;;  %vm4459_vm2 = vcmp.eq.s32.totalorder %v7044_v3, 2 }
 0x2f4   :  { %4072 = vmatmul.mubr.bf16.vlgmr.msra.gmra.mrb[16].mxu1 %v3909_v13 }
 0x2f5   :  { %5115 = vmatpush3.bf16.msk.msra.mxu1 %vm7012_vm3, %v5110_v34 }
 0x2f6   :  { %5118 = vmatprep.subr.msk.bf16.mxu1 %vm7012_vm3, %v5110_v34 }
 0x346   :  { %v5038_v19 = vpop.f32.mrb[8].mxu1 }
 0x347   :  { %v5039_v20 = vpop.f32.mrb[9].mxu1 }
 0x348   :  { %v5040_v21 = vadd.f32 %v5039_v20, %v5038_v19  ;;  %v5041_v26 = vpop.f32.mrb[10].mxu1  ;;  %v5015_v19 = vsel %vm4330_vm12, 1.0, %v5994_v4  ;;  %v5016_v20 = vsel %vm4369_vm13, 1.0, %v5994_v4 }
 0x349   :  { %v5042_v27 = vpop.f32.mrb[11].mxu1 }
 0x34a   :  { %v5043_v60 = vadd.f32 %v5042_v27, %v5041_v26  ;;  %v5017_v26 = vsel %vm4406_vm14, 1.0, %v5994_v4 }
 0x34b   :  { %v4424_v46 = vmul.f32 %v5017_v26, %v4325_v8 }
 0x366   :  { %v5060_v23 = vpop.f32.mrb[12].mxu1 }
 0x367   :  { %v5061_v28 = vpop.f32.mrb[13].mxu1 }
 0x368   :  { %v5062_v63 = vadd.f32 %v5061_v28, %v5060_v23  ;;  %v5063_v30 = vpop.f32.mrb[14].mxu1  ;;  %v4348_v23 = vmul.f32 %v5015_v19, %v4325_v8 }
 0x369   :  { %v5064_v31 = vpop.f32.mrb[15].mxu1 }
 0x36a   :  { %v3903_v32 = vadd.f32 %v5062_v63, %v5040_v21  ;;  %v5065_v33 = vadd.f32 %v5064_v31, %v5063_v30 }
 0x36c   :  { %v3906_v22 = vadd.f32 %v5065_v33, %v5043_v60  ;;  %v4347_v60 = vmul.f32 %v5015_v19, %v4324_v9 }
 0x3c7   :  { %v5082_v35 = vpop.f32.mrb[16].mxu1 }
 0x3c8   :  { %v5083_v36 = vpop.f32.mrb[17].mxu1 }
 0x3c9   :  { %v5084_v37 = vadd.f32 %v5083_v36, %v5082_v35  ;;  %v5085_v38 = vpop.f32.mrb[18].mxu1 }
 0x3ca   :  { %v5086_v41 = vpop.f32.mrb[19].mxu1 }
 0x3cb   :  { %v4080_v24 = vadd.f32 %v5084_v37, %v3903_v32  ;;  %v5087_v29 = vadd.f32 %v5086_v41, %v5085_v38  ;;  %v4349_v38 = vsel %vm4093_vm0, %v4347_v60, 0.0  ;;  %v4350_v41 = vsel %vm4093_vm0, %v4348_v23, 0.0 }
 0x3cd   :  { %v4081_v43 = vadd.f32 %v5087_v29, %v3906_v22  ;;  %v4089_v44 = vadd.f32 %v5006_v42, %v4080_v24 }
 0x3cf   :  { %v4094_v15 = vsel %vm4093_vm0, %v4089_v44, -inf  ;;  %v4090_v16 = vadd.f32 %v5006_v42, %v4081_v43 }
 0x3d0   :  { %4095 = vmax.xlane.f32.xlu0 %v4094_v15  ;;  %v4386_v15 = vmul.f32 %v5016_v20, %v4324_v9 }
 0x3d1   :  { %v4097_v18 = vsel %vm4093_vm0, %v4090_v16, -inf }
 0x3d2   :  { %v4388_v45 = vsel %vm4093_vm0, %v4386_v15, 0.0 }
 0x3d4   :  { %4098 = vmax.xlane.f32.xlu0 %v4097_v18 }
 0x45d   :  { %v4096_v47 = vpop.xlane.xlu0 %4095 }
 0x45e   :  { %v4100_v48 = vsub.f32 %v4089_v44, %v4096_v47  ;;  %v4351_v44 = vadd.f32 %v4350_v41, %v4349_v38 }
 0x460   :  { %v4102_v49 = vmul.f32 1.442695, %v4100_v48 }
 0x461   :  { %v4099_v39 = vpop.xlane.xlu0 %4098 }
 0x462   :  { %5940 = vpow2.f32 %v4102_v49  ;;  %v4101_v40 = vsub.f32 %v4090_v16, %v4099_v39  ;;  %v4387_v16 = vmul.f32 %v5016_v20, %v4325_v8  ;;  %v4426_v39 = vsel %vm4093_vm0, %v4424_v46, 0.0 }
 0x464   :  { %v4104_v50 = vmul.f32 1.442695, %v4101_v40  ;;  %v4389_v25 = vsel %vm4093_vm0, %v4387_v16, 0.0 }
 0x465   :  { %v4390_v48 = vadd.f32 %v4389_v25, %v4388_v45 }
 0x466   :  { %5942 = vpow2.f32 %v4104_v50 }
 0x46c   :  { %v5941_v52 = vpop.eup %5940 }
 0x46d   :  { %5100 = vmatprep.mubr.msk.f32.mxu1 %vm4093_vm0, %v5941_v52 }
 0x470   :  { %v5943_v53 = vpop.eup %5942 }
 0x471   :  { %5101 = vmatmul.mubr.msk.f32.vlgmr.msra.gmra.mrb[20].mxu1 %vm4093_vm0, %v5943_v53 }
 0x472   :  { %5121 = vmatpush3.bf16.msk.msra.mxu1 %vm7012_vm3, %v5110_v34  ;;  %v4423_v34 = vmul.f32 %v5017_v26, %v4324_v9  ;;  %vm4471_vm3 = vcmask 24576  }
 0x474   :  { %v4425_v49 = vsel %vm4093_vm0, %v4423_v34, 0.0 }
 0x475   :  { %v4427_v40 = vadd.f32 %v4426_v39, %v4425_v49 }
 0x544   :  { %v5102_v54 = vpop.f32.mrb[20].mxu1 }
 0x545   :  { %5944 = vrcp.f32 %v5102_v54  ;;  %v4182_v11 = vpop.f32.mrb[21].mxu1 }
 0x546   :  { %5946 = vrcp.f32 %v4182_v11 }
 0x54f   :  { %v5945_v12 = vpop.eup %5944 }
 0x550   :  { %v5947_v17 = vpop.eup %5946  ;;  %v7026_v55 = vmul.f32 %v5945_v12, %v5943_v53 }
 0x551   :  { %v7028_v56 = vmul.f32 %v5947_v17, %v5941_v52 }
 0x552   :  { %v4295_v57 = vmax.f32 %v7026_v55, 1e-05  ;;  %v4198_v47 = vsel %vm4093_vm0, %v7026_v55, -inf }
 0x553   :  { %v4195_v58 = vsel %vm4093_vm0, %v7028_v56, -inf  ;;  %v4294_v59 = vmax.f32 %v7028_v56, 1e-05 }
 0x554   :  { %4196 = vmax.xlane.f32.xlu0 %v4195_v58  ;;  %v4297_v0 = vmin.f32 %v4295_v57, 0.99999 }
 0x555   :  { %v4296_v2 = vmin.f32 %v4294_v59, 0.99999 }
 0x556   :  { %5948 = vlog2.f32 %v4297_v0 }
 0x557   :  { %5950 = vlog2.f32 %v4296_v2 }
 0x560   :  { %v5949_v51 = vpop.eup %5948 }
 0x561   :  { %v5951_v10 = vpop.eup %5950  ;;  %v4301_v13 = vmul.f32 0.6931472, %v5949_v51 }
 0x562   :  { %v4299_v14 = vmul.f32 0.6931472, %v5951_v10 }
 0x563   :  { %v4327_v21 = vmul.f32 %v4325_v8, %v4301_v13 }
 0x564   :  { %v4326_v27 = vmul.f32 %v4324_v9, %v4299_v14 }
 0x565   :  { %v4334_v28 = vmul.f32 %v5015_v19, %v4327_v21  ;;  %v4373_v63 = vmul.f32 %v5016_v20, %v4327_v21  ;;  %v4410_v33 = vmul.f32 %v5017_v26, %v4327_v21 }
 0x566   :  { %v4333_v30 = vmul.f32 %v5015_v19, %v4326_v27  ;;  %v4372_v31 = vmul.f32 %v5016_v20, %v4326_v27  ;;  %v4409_v32 = vmul.f32 %v5017_v26, %v4326_v27 }
 0x567   :  { %v4336_v22 = vsel %vm4093_vm0, %v4334_v28, 0.0  ;;  %v4375_v35 = vsel %vm4093_vm0, %v4373_v63, 0.0  ;;  %v4412_v43 = vsel %vm4093_vm0, %v4410_v33, 0.0 }
 0x568   :  { %v4335_v36 = vsel %vm4093_vm0, %v4333_v30, 0.0  ;;  %v4374_v37 = vsel %vm4093_vm0, %v4372_v31, 0.0  ;;  %v4411_v29 = vsel %vm4093_vm0, %v4409_v32, 0.0 }
 0x569   :  { %v4337_v42 = vadd.f32 %v4336_v22, %v4335_v36  ;;  %v4376_v24 = vadd.f32 %v4375_v35, %v4374_v37  ;;  %v4413_v18 = vadd.f32 %v4412_v43, %v4411_v29 }
 0x56b   :  { %4338 = vadd.xlane.f32.xlu1 %v4337_v42  ;;  %4377 = vadd.xlane.f32.xlu0 %v4376_v24 }
 0x56f   :  { %4352 = vadd.xlane.f32.xlu1 %v4351_v44  ;;  %4414 = vadd.xlane.f32.xlu0 %v4413_v18 }
 0x573   :  { %4199 = vmax.xlane.f32.xlu1 %v4198_v47 }
 0x577   :  { %4391 = vadd.xlane.f32.xlu1 %v4390_v48 }
 0x57b   :  { %4428 = vadd.xlane.f32.xlu1 %v4427_v40 }
 0x5e1   :  { %v4197_v50 = vpop.xlane.xlu0 %4196 }
 0x5e2   :  { %v4201_v52 = vsub.f32 %v7028_v56, %v4197_v50  ;;  %v5019_v50 = vsel %vm4453_vm15, 1.0, %v5994_v4 }
 0x5e4   :  { %v4203_v53 = vmul.f32 1.442695, %v4201_v52 }
 0x5e6   :  { %5952 = vpow2.f32 %v4203_v53  ;;  %v5018_v53 = vsel %vm4448_vm1, 1.0, %v5994_v4 }
 0x5f0   :  { %v7073_v54 = vpop.eup %5952 }
 0x5f1   :  { %5107 = vmatprep.mubr.msk.f32.mxu1 %vm4093_vm0, %v7073_v54 }
 0x5f8   :  { %v4339_v11 = vpop.xlane.xlu1 %4338  ;;  %v4378_v10 = vpop.xlane.xlu0 %4377 }
 0x5f9   :  { %v4340_v12 = vrot.slane %v4339_v11, 4  ;;  %v4379_v14 = vrot.slane %v4378_v10, 4 }
 0x5fb   :  { %v4341_v17 = vadd.f32 %v4340_v12, %v4339_v11  ;;  %v4380_v20 = vadd.f32 %v4379_v14, %v4378_v10 }
 0x5fc   :  { %v4353_v57 = vpop.xlane.xlu1 %4352  ;;  %v4415_v33 = vpop.xlane.xlu0 %4414 }
 0x5fd   :  { %v4342_v58 = vrot.slane %v4341_v17, 2  ;;  %v4354_v59 = vrot.slane %v4353_v57, 4  ;;  %v4381_v21 = vrot.slane %v4380_v20, 2  ;;  %v4416_v35 = vrot.slane %v4415_v33, 4 }
 0x5ff   :  { %v4355_v61 = vadd.f32 %v4354_v59, %v4353_v57  ;;  %v4343_v62 = vadd.f32 %v4342_v58, %v4341_v17  ;;  %v4382_v60 = vadd.f32 %v4381_v21, %v4380_v20  ;;  %v4417_v37 = vadd.f32 %v4416_v35, %v4415_v33 }
 0x600   :  { %v4200_v0 = vpop.xlane.xlu1 %4199 }
 0x601   :  { %v4356_v1 = vrot.slane %v4355_v61, 2  ;;  %v4202_v2 = vsub.f32 %v7026_v55, %v4200_v0  ;;  %v4344_v56 = vrot.slane %v4343_v62, 1  ;;  %v4383_v28 = vrot.slane %v4382_v60, 1 }
 0x602   :  { %v4418_v41 = vrot.slane %v4417_v37, 2 }
 0x603   :  { %v4205_v5 = vmul.f32 1.442695, %v4202_v2  ;;  %v4345_v6 = vadd.f32 %v4344_v56, %v4343_v62  ;;  %v4357_v7 = vadd.f32 %v4356_v1, %v4355_v61  ;;  %v4384_v31 = vadd.f32 %v4383_v28, %v4382_v60 }
 0x604   :  { %v4392_v13 = vpop.xlane.xlu1 %4391  ;;  %v4419_v29 = vadd.f32 %v4418_v41, %v4417_v37 }
 0x605   :  { %5954 = vpow2.f32 %v4205_v5  ;;  %5178 = vpush %v4345_v6  ;;  %v4358_v8 = vrot.slane %v4357_v7, 1  ;;  %v4393_v19 = vrot.slane %v4392_v13, 4 }
 0x606   :  { %v4420_v44 = vrot.slane %v4419_v29, 1 }
 0x607   :  { %v4359_v51 = vadd.f32 %v4358_v8, %v4357_v7  ;;  %v4394_v55 = vadd.f32 %v4393_v19, %v4392_v13 }
 0x608   :  { %v4429_v22 = vpop.xlane.xlu1 %4428  ;;  %v4421_v18 = vadd.f32 %v4420_v44, %v4419_v29 }
 0x609   :  { %5180 = vpush %v4359_v51  ;;  %v4395_v26 = vrot.slane %v4394_v55, 2  ;;  %v4430_v36 = vrot.slane %v4429_v22, 4 }
 0x60b   :  { %v4396_v23 = vadd.f32 %v4395_v26, %v4394_v55  ;;  %v4431_v38 = vadd.f32 %v4430_v36, %v4429_v22 }
 0x60d   :  { %v4397_v63 = vrot.slane %v4396_v23, 1  ;;  %v4432_v42 = vrot.slane %v4431_v38, 2 }
 0x60f   :  { %v7078_v9 = vpop.eup %5954  ;;  %v4398_v32 = vadd.f32 %v4397_v63, %v4396_v23  ;;  %v4433_v43 = vadd.f32 %v4432_v42, %v4431_v38 }
 0x610   :  { %5108 = vmatmul.mubr.msk.f32.vlgmr.msra.gmra.mrb[22].mxu1 %vm4093_vm0, %v7078_v9 }
 0x611   :  { %v4434_v15 = vrot.slane %v4433_v43, 1 }
 0x613   :  { %v4435_v45 = vadd.f32 %v4434_v15, %v4433_v43 }
 0x636   :  { %s5179_s15 = spop %5178 }
 0x637   :  { %s4361_s19 = ssub.f32 0.0, %s5179_s15 }
 0x63a   :  { %s5181_s16 = spop %5180 }
 0x63b   :  { %s4362_s28 = smax.f32 %s5995_s3, %s5181_s16 }
 0x63c   :  { %v4363_v27 = vstv %s4362_s28 }
 0x63d   :  { %5956 = vrcp.f32 %v4363_v27 }
 0x647   :  { %v5957_v30 = vpop.eup %5956 }
 0x648   :  { %5182 = vpush %v5957_v30 }
 0x649   :  { %5184 = vpush %v4384_v31 }
 0x64a   :  { %5186 = vpush %v4398_v32 }
 0x679   :  { %s5183_s7 = spop %5182 }
 0x67a   :  { %s7083_s1 = smul.f32 %s5183_s7, %s4361_s19  ;;  %s5185_s29 = spop %5184 }
 0x67b   :  { %s5187_s20 = spop %5186  ;;  %s4400_s5 = ssub.f32 0.0, %s5185_s29 }
 0x67c   :  { %s4401_s9 = smax.f32 %s5995_s3, %s5187_s20  ;;  %v4456_v52 = vstv %s7083_s1 }
 0x67d   :  { %v4402_v24 = vstv %s4401_s9  ;;  %v4457_v17 = vmul.f32 %v5019_v50, %v4456_v52 }
 0x67e   :  { %5958 = vrcp.f32 %v4402_v24 }
 0x688   :  { %v5959_v16 = vpop.eup %5958 }
 0x689   :  { %5188 = vpush %v5959_v16 }
 0x68a   :  { %5190 = vpush %v4421_v18 }
 0x68b   :  { %5192 = vpush %v4435_v45 }
 0x6ba   :  { %s5189_s21 = spop %5188 }
 0x6bb   :  { %s7086_s22 = smul.f32 %s5189_s21, %s4400_s5  ;;  %s5191_s23 = spop %5190 }
 0x6bc   :  { %s5193_s10 = spop %5192  ;;  %s4437_s4 = ssub.f32 0.0, %s5191_s23 }
 0x6bd   :  { %s4438_s8 = smax.f32 %s5995_s3, %s5193_s10  ;;  %v4462_v11 = vstv %s7086_s22 }
 0x6be   :  { %v4439_v25 = vstv %s4438_s8 }
 0x6bf   :  { %5960 = vrcp.f32 %v4439_v25 }
 0x6c9   :  { %v5961_v34 = vpop.eup %5960 }
 0x6ca   :  { %5194 = vpush %v5961_v34 }
 0x6e3   :  { %v5109_v46 = vpop.f32.mrb[22].mxu1 }
 0x6e4   :  { %5962 = vrcp.f32 %v5109_v46  ;;  %v4279_v47 = vpop.f32.mrb[23].mxu1 }
 0x6e5   :  { %5964 = vrcp.f32 %v4279_v47 }
 0x6ee   :  { %v5963_v48 = vpop.eup %5962 }
 0x6ef   :  { %v5965_v49 = vpop.eup %5964  ;;  %v4291_v39 = vmul.f32 %v5963_v48, %v7078_v9 }
 0x6f0   :  { %v4290_v40 = vmul.f32 %v5965_v49, %v7073_v54  ;;  %v5020_v54 = vsel %vm4459_vm2, 1.0, %v5994_v4 }
 0x6f1   :  { %4293 = vst.msk [vmem:[%s7131_s17 + $0x8] sm:$0xff] %vm4093_vm0, %v4291_v39  ;;  %v4463_v58 = vmul.f32 %v5020_v54, %v4462_v11 }
 0x6f2   :  { %4292 = vst.msk [vmem:[%s7131_s17] sm:$0xff] %vm4093_vm0, %v4290_v40  ;;  %vm4465_vm0 = vcmp.eq.s32.totalorder %v7044_v3, 3 }
 0x6f3   :  { %v5021_v61 = vsel %vm4465_vm0, 1.0, %v5994_v4 }
 0x6fb   :  { %s5195_s12 = spop %5194 }
 0x6fc   :  { %s4442_s13 = smul.f32 %s5195_s12, %s4437_s4 }
 0x6fe   :  { %s4443_s6 = sadd.f32 %s4442_s13, %s7083_s1  ;;  %v4451_v12 = vstv %s4442_s13 }
 0x6ff   :  { %v4452_v57 = vmul.f32 %v5018_v53, %v4451_v12 }
 0x700   :  { %s4444_s17 = sadd.f32 %s4443_s6, %s7086_s22 }
 0x701   :  { %v4458_v59 = vadd.f32 %v4457_v17, %v4452_v57 }
 0x702   :  { %s4447_s26 = smul.f32 0.33333334, %s4444_s17 }
 0x703   :  { %v4464_v62 = vadd.f32 %v4463_v58, %v4458_v59 }
 0x704   :  { %v4468_v0 = vstv %s4447_s26 }
 0x705   :  { %v4469_v1 = vmul.f32 %v5021_v61, %v4468_v0 }
 0x707   :  { %v4470_v2 = vadd.f32 %v4469_v1, %v4464_v62 }
 0x709   :  { %4472 = vst.msk [vmem:[%s7132_s18] sm:$0x1] %vm4471_vm3, %v4470_v2 }
 0x70a   :  { %4481 = vsyncpa [#allocation3], 1 }

</bundles_post_ra>
